<compile_context>
chip_gen: v7x
topology: tpu7x:2x2x1
jax: 0.10.0
libtpu: 0.0.40
codegen_flags: <defaults>
</compile_context>

<pallas_src>
import math
from functools import partial

import jax
import jax.numpy as jnp
from jax import lax
from jax.experimental import pallas as pl
from jax.experimental.pallas import tpu as pltpu


def _round_up(x, m):
    return ((x + m - 1) // m) * m


# ----------------------------------------------------------------------------
# Multi-head attention (num_heads == 1) + residual + LayerNorm, one batch per step
# ----------------------------------------------------------------------------
def _mha_kernel(enc_ref, mask_ref, wq_ref, wk_ref, wv_ref, wo_ref, g_ref, b_ref,
                o_ref, attn_ref, *, scale):
    x = enc_ref[0]                                                     # (S, H) native dtype
    q = jnp.dot(x, wq_ref[...], preferred_element_type=jnp.float32)   # (S, H) f32
    k = jnp.dot(x, wk_ref[...], preferred_element_type=jnp.float32)
    v = jnp.dot(x, wv_ref[...], preferred_element_type=jnp.float32)

    scores = jnp.einsum("qd,kd->qk", q, k,
                        preferred_element_type=jnp.float32) * scale    # (S, S)
    scores = jnp.where(mask_ref[0] == 0, jnp.float32(-1e9), scores)

    scores = scores - jnp.max(scores, axis=-1, keepdims=True)
    e = jnp.exp(scores)
    attn = e / jnp.sum(e, axis=-1, keepdims=True)                      # (S, S) f32
    # TODO(synk): training-mode dropout on attn / projection not implemented (eval = identity)

    ctx = jnp.dot(attn.astype(v.dtype), v, preferred_element_type=jnp.float32)   # (S, H)
    proj = jnp.dot(ctx.astype(wo_ref.dtype), wo_ref[...],
                   preferred_element_type=jnp.float32)

    y = proj + x.astype(jnp.float32)                                   # residual
    mean = jnp.mean(y, axis=-1, keepdims=True)
    cen = y - mean
    var = jnp.mean(cen * cen, axis=-1, keepdims=True)
    out = cen * lax.rsqrt(var + 1e-6)
    out = out * g_ref[...].astype(jnp.float32) + b_ref[...].astype(jnp.float32)

    o_ref[0] = out.astype(o_ref.dtype)
    attn_ref[0] = attn.astype(attn_ref.dtype)


def multi_head_attention(enc, mask, wq, wk, wv, wo, gamma, beta, *, num_heads=1,
                         vmem_limit_bytes=64 * 1024 * 1024):
    B, S, H = enc.shape
    # The reference torch module's `.view(B, S, num_heads, hidden_units)` on a (B, S, H)
    # tensor only works when num_heads == 1; that is the only runnable configuration.
    assert num_heads == 1, "reference module's .view only type-checks for num_heads == 1"

    mask2 = mask.reshape(B, -1, S, S)[:, 0].astype(jnp.float32)        # (B, S, S)
    g2 = gamma.reshape(1, H)
    b2 = beta.reshape(1, H)

    kernel = partial(_mha_kernel, scale=1.0 / math.sqrt(H))

    out, attn = pl.pallas_call(
        kernel,
        out_shape=(jax.ShapeDtypeStruct((B, S, H), enc.dtype),
                   jax.ShapeDtypeStruct((B, S, S), jnp.float32)),
        grid_spec=pltpu.PrefetchScalarGridSpec(
            num_scalar_prefetch=0,
            grid=(B,),
            in_specs=[
                pl.BlockSpec((1, S, H), lambda b: (b, 0, 0)),   # enc rows for this batch
                pl.BlockSpec((1, S, S), lambda b: (b, 0, 0)),   # mask
                pl.BlockSpec((H, H), lambda b: (0, 0)),         # W_Q
                pl.BlockSpec((H, H), lambda b: (0, 0)),         # W_K
                pl.BlockSpec((H, H), lambda b: (0, 0)),         # W_V
                pl.BlockSpec((H, H), lambda b: (0, 0)),         # W_O
                pl.BlockSpec((1, H), lambda b: (0, 0)),         # gamma
                pl.BlockSpec((1, H), lambda b: (0, 0)),         # beta
            ],
            out_specs=(pl.BlockSpec((1, S, H), lambda b: (b, 0, 0)),
                       pl.BlockSpec((1, S, S), lambda b: (b, 0, 0))),
        ),
        compiler_params=pltpu.CompilerParams(
            dimension_semantics=("parallel",),
            vmem_limit_bytes=vmem_limit_bytes),
    )(enc, mask2, wq, wk, wv, wo, g2, b2)

    # TODO(synk): for long sequences this per-batch fully-resident attention should be
    # replaced by a flash-style (q-tile, kv-tile) online-softmax kernel.
    return out, attn.reshape(B, 1, S, S)


# ----------------------------------------------------------------------------
# Position-wise feed-forward + residual + LayerNorm, fused over a 4H reduction axis
# ----------------------------------------------------------------------------
def _ffn_kernel(x_ref, w1_ref, b1_ref, w2_ref, b2_ref, g_ref, beta_ref,
                o_ref, acc_ref, *, exact_gelu):
    k = pl.program_id(1)

    @pl.when(k == 0)
    def _init():
        # Fold the W_2 bias into the accumulator init (saves a (TM, H) VPU add later).
        acc_ref[...] = jnp.broadcast_to(b2_ref[...].astype(jnp.float32), acc_ref.shape)

    x = x_ref[...]                                                     # native dtype -> MXU
    h = jnp.dot(x, w1_ref[...], preferred_element_type=jnp.float32)   # (TM, tile_k) f32
    h = h + b1_ref[...].astype(jnp.float32)
    if exact_gelu:
        # erf-based gelu, matching torch.nn.functional.gelu default
        h = 0.5 * h * (1.0 + lax.erf(h * (1.0 / math.sqrt(2.0))))
    else:
        # tanh approximation: runs on the EUP (otherwise-idle VLIW slot) instead of the VPU
        h = jax.nn.gelu(h, approximate=True)
    # TODO(synk): training-mode dropout (stateful PRNG mask) not implemented (eval = identity)
    acc_ref[...] += jnp.dot(h.astype(w2_ref.dtype), w2_ref[...],
                            preferred_element_type=jnp.float32)

    @pl.when(k == pl.num_programs(1) - 1)
    def _finalize():
        y = acc_ref[...] + x_ref[...].astype(jnp.float32)              # residual (b2 already in acc)
        mean = jnp.mean(y, axis=-1, keepdims=True)
        cen = y - mean
        var = jnp.mean(cen * cen, axis=-1, keepdims=True)
        out = cen * lax.rsqrt(var + 1e-6)
        out = out * g_ref[...].astype(jnp.float32) + beta_ref[...].astype(jnp.float32)
        o_ref[...] = out.astype(o_ref.dtype)


def positionwise_feed_forward(x, w1, b1, w2, b2, gamma, beta, *,
                              tile_m=256, tile_k=512, exact_gelu=True,
                              vmem_limit_bytes=64 * 1024 * 1024):
    """x: (B, S, H) -> (B, S, H). w1: (H, 4H), w2: (4H, H) (torch weights transposed)."""
    B, S, H = x.shape
    H4 = w1.shape[1]
    assert w1.shape == (H, H4) and w2.shape == (H4, H)

    N = B * S
    # Row tile: big enough to feed the MXU, never larger than the (8-aligned) row count.
    tile_m = max(8, min(tile_m, _round_up(N, 8)))
    Np = _round_up(N, tile_m)

    # Reduction (4H) chunk: multiples of 128 keep lanes dense; fall back to un-chunked
    # if it does not divide evenly.
    tile_k = min(tile_k, H4)
    if H4 % tile_k != 0 or tile_k % 128 != 0:
        tile_k = H4

    x2 = x.reshape(N, H)
    if Np != N:
        x2 = jnp.pad(x2, ((0, Np - N), (0, 0)))      # padded rows are sliced off below

    b1_2 = b1.reshape(1, H4)
    b2_2 = b2.reshape(1, H)
    g_2 = gamma.reshape(1, H)
    be_2 = beta.reshape(1, H)

    grid = (Np // tile_m, H4 // tile_k)

    itemsize = jnp.dtype(x.dtype).itemsize
    w_itemsize = jnp.dtype(w1.dtype).itemsize
    cost = pl.CostEstimate(
        flops=4 * N * H * H4,                        # two matmuls
        transcendentals=N * H4,                      # one erf/tanh per hidden element
        bytes_accessed=(2 * N * H * itemsize         # x in + out
                        + (H * H4 + H4 * H) * w_itemsize
                        + (H4 + 3 * H) * 4))

    kernel = partial(_ffn_kernel, exact_gelu=exact_gelu)

    # TODO(synk): pl.Buffered(1) on the constant-index weight/bias specs would halve their
    # VMEM footprint on v6e; left at the default buffering for portability.
    out2 = pl.pallas_call(
        kernel,
        out_shape=jax.ShapeDtypeStruct((Np, H), x.dtype),
        grid_spec=pltpu.PrefetchScalarGridSpec(
            num_scalar_prefetch=0,
            grid=grid,
            in_specs=[
                pl.BlockSpec((tile_m, H), lambda i, k: (i, 0)),   # x rows (reused over k)
                pl.BlockSpec((H, tile_k), lambda i, k: (0, k)),   # W1 chunk
                pl.BlockSpec((1, tile_k), lambda i, k: (0, k)),   # b1 chunk
                pl.BlockSpec((tile_k, H), lambda i, k: (k, 0)),   # W2 chunk
                pl.BlockSpec((1, H), lambda i, k: (0, 0)),        # b2
                pl.BlockSpec((1, H), lambda i, k: (0, 0)),        # gamma
                pl.BlockSpec((1, H), lambda i, k: (0, 0)),        # beta
            ],
            out_specs=pl.BlockSpec((tile_m, H), lambda i, k: (i, 0)),
            scratch_shapes=[pltpu.VMEM((tile_m, H), jnp.float32)],
        ),
        compiler_params=pltpu.CompilerParams(
            dimension_semantics=("parallel", "arbitrary"),
            vmem_limit_bytes=vmem_limit_bytes),
        cost_estimate=cost,
    )(x2, w1, b1_2, w2, b2_2, g_2, be_2)

    return out2[:N].reshape(B, S, H)


# ----------------------------------------------------------------------------
# Full block
# ----------------------------------------------------------------------------
def bert4rec_block(enc, mask, params, *, num_heads=1, tile_m=256, tile_k=512,
                   exact_gelu=True):
    out1, attn_dist = multi_head_attention(
        enc, mask, params["wq"], params["wk"], params["wv"], params["wo"],
        params["ln1_g"], params["ln1_b"], num_heads=num_heads)
    out2 = positionwise_feed_forward(
        out1, params["w1"], params["b1"], params["w2"], params["b2"],
        params["ln2_g"], params["ln2_b"],
        tile_m=tile_m, tile_k=tile_k, exact_gelu=exact_gelu)
    return out2, attn_dist


# ----------------------------------------------------------------------------
# Pure-JAX reference
# ----------------------------------------------------------------------------
def _ln(y, g, b, eps=1e-6):
    mean = jnp.mean(y, axis=-1, keepdims=True)
    var = jnp.mean((y - mean) ** 2, axis=-1, keepdims=True)
    return (y - mean) * lax.rsqrt(var + eps) * g + b


def _reference_block(enc, mask, p):
    x = enc.astype(jnp.float32)
    B, S, H = x.shape
    q, k, v = x @ p["wq"], x @ p["wk"], x @ p["wv"]
    scores = jnp.einsum("bqh,bkh->bqk", q, k) / math.sqrt(H)
    scores = jnp.where(mask.reshape(B, S, S) == 0, -1e9, scores)
    attn = jax.nn.softmax(scores, axis=-1)
    ctx = jnp.einsum("bqk,bkh->bqh", attn, v)
    y = _ln(ctx @ p["wo"] + x, p["ln1_g"], p["ln1_b"])
    h = jax.nn.gelu(y @ p["w1"] + p["b1"], approximate=False)
    z = _ln(h @ p["w2"] + p["b2"] + y, p["ln2_g"], p["ln2_b"])
    return z.astype(enc.dtype), attn.reshape(B, 1, S, S)


if __name__ == "__main__":
    B, S, H, NUM_HEADS = 2, 8, 128, 1        # H multiple of 128 -> lane-dense stores
    H4 = 4 * H

    key = jax.random.PRNGKey(0)
    keys = jax.random.split(key, 9)

    enc = jax.random.normal(keys[0], (B, S, H), dtype=jnp.float32)

    # key-padding mask (B, 1, S, S): batch 0 full length, batch 1 only first 5 keys valid
    lengths = jnp.array([S, 5])
    valid = (jnp.arange(S)[None, :] < lengths[:, None]).astype(jnp.float32)   # (B, S)
    mask = jnp.broadcast_to(valid[:, None, None, :], (B, 1, S, S))

    def lin(k, fan_in, shape):
        return jax.random.normal(k, shape, dtype=jnp.float32) * (1.0 / math.sqrt(fan_in))

    params = dict(
        wq=lin(keys[1], H, (H, H)), wk=lin(keys[2], H, (H, H)),
        wv=lin(keys[3], H, (H, H)), wo=lin(keys[4], H, (H, H)),
        ln1_g=jnp.ones((H,), jnp.float32), ln1_b=jnp.zeros((H,), jnp.float32),
        w1=lin(keys[5], H, (H, H4)),
        b1=jax.random.normal(keys[6], (H4,), jnp.float32) * 0.01,
        w2=lin(keys[7], H4, (H4, H)),
        b2=jax.random.normal(keys[8], (H,), jnp.float32) * 0.01,
        ln2_g=jnp.ones((H,), jnp.float32), ln2_b=jnp.zeros((H,), jnp.float32),
    )

    block = jax.jit(partial(bert4rec_block, num_heads=NUM_HEADS))
    out_enc, attn_dist = block(enc, mask, params)
    out_enc = jax.block_until_ready(out_enc)
    attn_dist = jax.block_until_ready(attn_dist)

    ref_out, ref_attn = _reference_block(enc, mask, params)

    assert out_enc.shape == (B, S, H) and attn_dist.shape == (B, 1, S, S)
    assert jnp.allclose(out_enc, ref_out, atol=2e-3, rtol=2e-3), "output mismatch vs. reference"
    assert jnp.allclose(attn_dist, ref_attn, atol=2e-3, rtol=2e-3), "attn mismatch vs. reference"

    print("KERNEL_OK")
</pallas_src>

<mosaic_0001>
module attributes {stable_mosaic.version = 11 : i64} {
  func.func @_ffn_kernel(%arg0: i32, %arg1: i32, %arg2: memref<16x128xf32, #tpu.memory_space<vmem>>, %arg3: memref<128x512xf32, #tpu.memory_space<vmem>>, %arg4: memref<1x512xf32, #tpu.memory_space<vmem>>, %arg5: memref<512x128xf32, #tpu.memory_space<vmem>>, %arg6: memref<1x128xf32, #tpu.memory_space<vmem>>, %arg7: memref<1x128xf32, #tpu.memory_space<vmem>>, %arg8: memref<1x128xf32, #tpu.memory_space<vmem>>, %arg9: memref<16x128xf32, #tpu.memory_space<vmem>>, %arg10: memref<16x128xf32, #tpu.memory_space<vmem>>) attributes {dimension_semantics = [#tpu.dimension_semantics<parallel>, #tpu.dimension_semantics<arbitrary>], iteration_bounds = array<i64: 1, 1>, scalar_prefetch = 0 : i64, scratch_operands = 1 : i64, tpu.core_type = #tpu.core_type<tc>, window_params = [{transform_indices = @transform_0, window_bounds = array<i64: 16, 128>}, {transform_indices = @transform_1, window_bounds = array<i64: 128, 512>}, {transform_indices = @transform_2, window_bounds = array<i64: 1, 512>}, {transform_indices = @transform_3, window_bounds = array<i64: 512, 128>}, {pipeline_mode = #tpu.pipeline_mode<synchronous>, transform_indices = @transform_4, window_bounds = array<i64: 1, 128>}, {pipeline_mode = #tpu.pipeline_mode<synchronous>, transform_indices = @transform_5, window_bounds = array<i64: 1, 128>}, {pipeline_mode = #tpu.pipeline_mode<synchronous>, transform_indices = @transform_6, window_bounds = array<i64: 1, 128>}, {transform_indices = @transform_7, window_bounds = array<i64: 16, 128>}]} {
    %c0_i32 = arith.constant 0 : i32
    %0 = arith.cmpi eq, %arg1, %c0_i32 : i32
    %1 = arith.extui %0 : i1 to i32
    %c0_i32_0 = arith.constant 0 : i32
    %2 = arith.cmpi ne, %1, %c0_i32_0 : i32
    scf.if %2 {
      %c0_18 = arith.constant 0 : index
      %c0_19 = arith.constant 0 : index
      %25 = vector.load %arg6[%c0_18, %c0_19] : memref<1x128xf32, #tpu.memory_space<vmem>>, vector<1x128xf32>
      %26 = vector.shape_cast %25 : vector<1x128xf32> to vector<1x128xf32>
      %27 = vector.broadcast %26 : vector<1x128xf32> to vector<16x128xf32>
      %c0_20 = arith.constant 0 : index
      %c0_21 = arith.constant 0 : index
      %28 = vector.load %arg10[%c0_20, %c0_21] : memref<16x128xf32, #tpu.memory_space<vmem>>, vector<16x128xf32>
      tpu.vector_store %arg10[%c0_20, %c0_21], %27 {strides = array<i32>} : memref<16x128xf32, #tpu.memory_space<vmem>>, vector<16x128xf32>,
    } else {
    }
    %c0 = arith.constant 0 : index
    %c0_1 = arith.constant 0 : index
    %3 = vector.load %arg2[%c0, %c0_1] : memref<16x128xf32, #tpu.memory_space<vmem>>, vector<16x128xf32>
    %c0_2 = arith.constant 0 : index
    %c0_3 = arith.constant 0 : index
    %4 = vector.load %arg3[%c0_2, %c0_3] : memref<128x512xf32, #tpu.memory_space<vmem>>, vector<128x512xf32>
    %cst = arith.constant dense<0.000000e+00> : vector<16x512xf32>
    %5 = tpu.matmul %3, %4, %cst {dimension_numbers = #tpu.dot_dimension_numbers<[1], [0], [0], [1], [0, 0, 1, 1], [], []>} : vector<16x128xf32>, vector<128x512xf32>, vector<16x512xf32> -> vector<16x512xf32>
    %c0_4 = arith.constant 0 : index
    %c0_5 = arith.constant 0 : index
    %6 = vector.load %arg4[%c0_4, %c0_5] : memref<1x512xf32, #tpu.memory_space<vmem>>, vector<1x512xf32>
    %7 = vector.broadcast %6 : vector<1x512xf32> to vector<16x512xf32>
    %8 = arith.addf %5, %7 : vector<16x512xf32>
    %cst_6 = arith.constant 5.000000e-01 : f32
    %9 = vector.broadcast %cst_6 : f32 to vector<16x512xf32>
    %10 = arith.mulf %9, %8 : vector<16x512xf32>
    %cst_7 = arith.constant 0.707106769 : f32
    %11 = vector.broadcast %cst_7 : f32 to vector<16x512xf32>
    %12 = arith.mulf %8, %11 : vector<16x512xf32>
    %13 = math.erf %12 : vector<16x512xf32>
    %cst_8 = arith.constant 1.000000e+00 : f32
    %14 = vector.broadcast %cst_8 : f32 to vector<16x512xf32>
    %15 = arith.addf %14, %13 : vector<16x512xf32>
    %16 = arith.mulf %10, %15 : vector<16x512xf32>
    %c0_9 = arith.constant 0 : index
    %c0_10 = arith.constant 0 : index
    %17 = vector.load %arg10[%c0_9, %c0_10] : memref<16x128xf32, #tpu.memory_space<vmem>>, vector<16x128xf32>
    %c0_11 = arith.constant 0 : index
    %c0_12 = arith.constant 0 : index
    %18 = vector.load %arg5[%c0_11, %c0_12] : memref<512x128xf32, #tpu.memory_space<vmem>>, vector<512x128xf32>
    %cst_13 = arith.constant dense<0.000000e+00> : vector<16x128xf32>
    %19 = tpu.matmul %16, %18, %cst_13 {dimension_numbers = #tpu.dot_dimension_numbers<[1], [0], [0], [1], [0, 0, 1, 1], [], []>} : vector<16x512xf32>, vector<512x128xf32>, vector<16x128xf32> -> vector<16x128xf32>
    %20 = arith.addf %17, %19 : vector<16x128xf32>
    %c0_14 = arith.constant 0 : index
    %c0_15 = arith.constant 0 : index
    %21 = vector.load %arg10[%c0_14, %c0_15] : memref<16x128xf32, #tpu.memory_space<vmem>>, vector<16x128xf32>
    tpu.vector_store %arg10[%c0_14, %c0_15], %20 {strides = array<i32>} : memref<16x128xf32, #tpu.memory_space<vmem>>, vector<16x128xf32>,
    %c0_i32_16 = arith.constant 0 : i32
    %22 = arith.cmpi eq, %arg1, %c0_i32_16 : i32
    %23 = arith.extui %22 : i1 to i32
    %c0_i32_17 = arith.constant 0 : i32
    %24 = arith.cmpi ne, %23, %c0_i32_17 : i32
    scf.if %24 {
      %c0_18 = arith.constant 0 : index
      %c0_19 = arith.constant 0 : index
      %25 = vector.load %arg10[%c0_18, %c0_19] : memref<16x128xf32, #tpu.memory_space<vmem>>, vector<16x128xf32>
      %c0_20 = arith.constant 0 : index
      %c0_21 = arith.constant 0 : index
      %26 = vector.load %arg2[%c0_20, %c0_21] : memref<16x128xf32, #tpu.memory_space<vmem>>, vector<16x128xf32>
      %27 = arith.addf %25, %26 : vector<16x128xf32>
      %cst_22 = arith.constant dense<0.000000e+00> : vector<16xf32>
      %28 = vector.multi_reduction <add>, %27, %cst_22 [1] : vector<16x128xf32> to vector<16xf32>
      %29 = vector.shape_cast %28 : vector<16xf32> to vector<16x1xf32>
      %cst_23 = arith.constant 1.280000e+02 : f32
      %30 = vector.broadcast %cst_23 : f32 to vector<16x1xf32>
      %31 = arith.divf %29, %30 : vector<16x1xf32>
      %32 = vector.broadcast %31 : vector<16x1xf32> to vector<16x128xf32>
      %33 = arith.subf %27, %32 : vector<16x128xf32>
      %34 = arith.mulf %33, %33 : vector<16x128xf32>
      %cst_24 = arith.constant dense<0.000000e+00> : vector<16xf32>
      %35 = vector.multi_reduction <add>, %34, %cst_24 [1] : vector<16x128xf32> to vector<16xf32>
      %36 = vector.shape_cast %35 : vector<16xf32> to vector<16x1xf32>
      %cst_25 = arith.constant 1.280000e+02 : f32
      %37 = vector.broadcast %cst_25 : f32 to vector<16x1xf32>
      %38 = arith.divf %36, %37 : vector<16x1xf32>
      %cst_26 = arith.constant 9.99999997E-7 : f32
      %39 = vector.broadcast %cst_26 : f32 to vector<16x1xf32>
      %40 = arith.addf %38, %39 : vector<16x1xf32>
      %41 = math.rsqrt %40 : vector<16x1xf32>
      %42 = vector.broadcast %41 : vector<16x1xf32> to vector<16x128xf32>
      %43 = arith.mulf %33, %42 : vector<16x128xf32>
      %c0_27 = arith.constant 0 : index
      %c0_28 = arith.constant 0 : index
      %44 = vector.load %arg7[%c0_27, %c0_28] : memref<1x128xf32, #tpu.memory_space<vmem>>, vector<1x128xf32>
      %45 = vector.broadcast %44 : vector<1x128xf32> to vector<16x128xf32>
      %46 = arith.mulf %43, %45 : vector<16x128xf32>
      %c0_29 = arith.constant 0 : index
      %c0_30 = arith.constant 0 : index
      %47 = vector.load %arg8[%c0_29, %c0_30] : memref<1x128xf32, #tpu.memory_space<vmem>>, vector<1x128xf32>
      %48 = vector.broadcast %47 : vector<1x128xf32> to vector<16x128xf32>
      %49 = arith.addf %46, %48 : vector<16x128xf32>
      %c0_31 = arith.constant 0 : index
      %c0_32 = arith.constant 0 : index
      %50 = vector.load %arg9[%c0_31, %c0_32] : memref<16x128xf32, #tpu.memory_space<vmem>>, vector<16x128xf32>
      tpu.vector_store %arg9[%c0_31, %c0_32], %49 {strides = array<i32>} : memref<16x128xf32, #tpu.memory_space<vmem>>, vector<16x128xf32>,
    } else {
    }
    return
  }
  func.func @transform_0(%arg0: i32, %arg1: i32) -> (i32, i32) {
    %c0_i32 = arith.constant 0 : i32
    %c0_i32_0 = arith.constant 0 : i32
    return %arg0, %c0_i32 : i32, i32
  }
  func.func @transform_1(%arg0: i32, %arg1: i32) -> (i32, i32) {
    %c0_i32 = arith.constant 0 : i32
    %c0_i32_0 = arith.constant 0 : i32
    return %c0_i32, %arg1 : i32, i32
  }
  func.func @transform_2(%arg0: i32, %arg1: i32) -> (i32, i32) {
    %c0_i32 = arith.constant 0 : i32
    %c0_i32_0 = arith.constant 0 : i32
    return %c0_i32, %arg1 : i32, i32
  }
  func.func @transform_3(%arg0: i32, %arg1: i32) -> (i32, i32) {
    %c0_i32 = arith.constant 0 : i32
    %c0_i32_0 = arith.constant 0 : i32
    return %arg1, %c0_i32 : i32, i32
  }
  func.func @transform_4(%arg0: i32, %arg1: i32) -> (i32, i32) {
    %c0_i32 = arith.constant 0 : i32
    %c0_i32_0 = arith.constant 0 : i32
    %c0_i32_1 = arith.constant 0 : i32
    return %c0_i32, %c0_i32_0 : i32, i32
  }
  func.func @transform_5(%arg0: i32, %arg1: i32) -> (i32, i32) {
    %c0_i32 = arith.constant 0 : i32
    %c0_i32_0 = arith.constant 0 : i32
    %c0_i32_1 = arith.constant 0 : i32
    return %c0_i32, %c0_i32_0 : i32, i32
  }
  func.func @transform_6(%arg0: i32, %arg1: i32) -> (i32, i32) {
    %c0_i32 = arith.constant 0 : i32
    %c0_i32_0 = arith.constant 0 : i32
    %c0_i32_1 = arith.constant 0 : i32
    return %c0_i32, %c0_i32_0 : i32, i32
  }
  func.func @transform_7(%arg0: i32, %arg1: i32) -> (i32, i32) {
    %c0_i32 = arith.constant 0 : i32
    %c0_i32_0 = arith.constant 0 : i32
    return %arg0, %c0_i32 : i32, i32
  }
}

module attributes {stable_mosaic.version = 11 : i64} {
  func.func @_mha_kernel(%arg0: i32, %arg1: memref<1x8x128xf32, #tpu.memory_space<vmem>>, %arg2: memref<1x8x8xf32, #tpu.memory_space<vmem>>, %arg3: memref<128x128xf32, #tpu.memory_space<vmem>>, %arg4: memref<128x128xf32, #tpu.memory_space<vmem>>, %arg5: memref<128x128xf32, #tpu.memory_space<vmem>>, %arg6: memref<128x128xf32, #tpu.memory_space<vmem>>, %arg7: memref<1x128xf32, #tpu.memory_space<vmem>>, %arg8: memref<1x128xf32, #tpu.memory_space<vmem>>, %arg9: memref<1x8x128xf32, #tpu.memory_space<vmem>>, %arg10: memref<1x8x8xf32, #tpu.memory_space<vmem>>) attributes {dimension_semantics = [#tpu.dimension_semantics<parallel>], iteration_bounds = array<i64: 2>, scalar_prefetch = 0 : i64, scratch_operands = 0 : i64, tpu.core_type = #tpu.core_type<tc>, window_params = [{transform_indices = @transform_0, window_bounds = array<i64: 1, 8, 128>}, {transform_indices = @transform_1, window_bounds = array<i64: 1, 8, 8>}, {pipeline_mode = #tpu.pipeline_mode<synchronous>, transform_indices = @transform_2, window_bounds = array<i64: 128, 128>}, {pipeline_mode = #tpu.pipeline_mode<synchronous>, transform_indices = @transform_3, window_bounds = array<i64: 128, 128>}, {pipeline_mode = #tpu.pipeline_mode<synchronous>, transform_indices = @transform_4, window_bounds = array<i64: 128, 128>}, {pipeline_mode = #tpu.pipeline_mode<synchronous>, transform_indices = @transform_5, window_bounds = array<i64: 128, 128>}, {pipeline_mode = #tpu.pipeline_mode<synchronous>, transform_indices = @transform_6, window_bounds = array<i64: 1, 128>}, {pipeline_mode = #tpu.pipeline_mode<synchronous>, transform_indices = @transform_7, window_bounds = array<i64: 1, 128>}, {transform_indices = @transform_8, window_bounds = array<i64: 1, 8, 128>}, {transform_indices = @transform_9, window_bounds = array<i64: 1, 8, 8>}]} {
    %c0 = arith.constant 0 : index
    %c0_0 = arith.constant 0 : index
    %c0_1 = arith.constant 0 : index
    %0 = vector.load %arg1[%c0, %c0_0, %c0_1] : memref<1x8x128xf32, #tpu.memory_space<vmem>>, vector<1x8x128xf32>
    %1 = vector.shape_cast %0 : vector<1x8x128xf32> to vector<8x128xf32>
    %c0_2 = arith.constant 0 : index
    %c0_3 = arith.constant 0 : index
    %2 = vector.load %arg3[%c0_2, %c0_3] : memref<128x128xf32, #tpu.memory_space<vmem>>, vector<128x128xf32>
    %cst = arith.constant dense<0.000000e+00> : vector<8x128xf32>
    %3 = tpu.matmul %1, %2, %cst {dimension_numbers = #tpu.dot_dimension_numbers<[1], [0], [0], [1], [0, 0, 1, 1], [], []>} : vector<8x128xf32>, vector<128x128xf32>, vector<8x128xf32> -> vector<8x128xf32>
    %c0_4 = arith.constant 0 : index
    %c0_5 = arith.constant 0 : index
    %4 = vector.load %arg4[%c0_4, %c0_5] : memref<128x128xf32, #tpu.memory_space<vmem>>, vector<128x128xf32>
    %cst_6 = arith.constant dense<0.000000e+00> : vector<8x128xf32>
    %5 = tpu.matmul %1, %4, %cst_6 {dimension_numbers = #tpu.dot_dimension_numbers<[1], [0], [0], [1], [0, 0, 1, 1], [], []>} : vector<8x128xf32>, vector<128x128xf32>, vector<8x128xf32> -> vector<8x128xf32>
    %c0_7 = arith.constant 0 : index
    %c0_8 = arith.constant 0 : index
    %6 = vector.load %arg5[%c0_7, %c0_8] : memref<128x128xf32, #tpu.memory_space<vmem>>, vector<128x128xf32>
    %cst_9 = arith.constant dense<0.000000e+00> : vector<8x128xf32>
    %7 = tpu.matmul %1, %6, %cst_9 {dimension_numbers = #tpu.dot_dimension_numbers<[1], [0], [0], [1], [0, 0, 1, 1], [], []>} : vector<8x128xf32>, vector<128x128xf32>, vector<8x128xf32> -> vector<8x128xf32>
    "tpu.trace_start"() <{level = 10 : i32, message = "qd,kd->qk"}> : () -> ()
    %cst_10 = arith.constant dense<0.000000e+00> : vector<8x8xf32>
    %8 = tpu.matmul %3, %5, %cst_10 {dimension_numbers = #tpu.dot_dimension_numbers<[1], [1], [0], [0], [0, 0, 1, 0], [], []>} : vector<8x128xf32>, vector<8x128xf32>, vector<8x8xf32> -> vector<8x8xf32>
    "tpu.trace_stop"() : () -> ()
    %cst_11 = arith.constant 0.0883883461 : f32
    %9 = vector.broadcast %cst_11 : f32 to vector<8x8xf32>
    %10 = arith.mulf %8, %9 : vector<8x8xf32>
    %c0_12 = arith.constant 0 : index
    %c0_13 = arith.constant 0 : index
    %c0_14 = arith.constant 0 : index
    %11 = vector.load %arg2[%c0_12, %c0_13, %c0_14] : memref<1x8x8xf32, #tpu.memory_space<vmem>>, vector<1x8x8xf32>
    %12 = vector.shape_cast %11 : vector<1x8x8xf32> to vector<8x8xf32>
    %cst_15 = arith.constant 0.000000e+00 : f32
    %13 = vector.broadcast %cst_15 : f32 to vector<8x8xf32>
    %14 = arith.cmpf oeq, %12, %13 : vector<8x8xf32>
    %cst_16 = arith.constant -1.000000e+09 : f32
    %15 = vector.broadcast %cst_16 : f32 to vector<8x8xf32>
    %16 = arith.select %14, %15, %10 : vector<8x8xi1>, vector<8x8xf32>
    %cst_17 = arith.constant dense<0xFF800000> : vector<8xf32>
    %17 = vector.multi_reduction <maximumf>, %16, %cst_17 [1] : vector<8x8xf32> to vector<8xf32>
    %18 = vector.shape_cast %17 : vector<8xf32> to vector<8x1xf32>
    %19 = vector.broadcast %18 : vector<8x1xf32> to vector<8x8xf32>
    %20 = arith.subf %16, %19 : vector<8x8xf32>
    %21 = math.exp %20 : vector<8x8xf32>
    %cst_18 = arith.constant dense<0.000000e+00> : vector<8xf32>
    %22 = vector.multi_reduction <add>, %21, %cst_18 [1] : vector<8x8xf32> to vector<8xf32>
    %23 = vector.shape_cast %22 : vector<8xf32> to vector<8x1xf32>
    %24 = vector.broadcast %23 : vector<8x1xf32> to vector<8x8xf32>
    %25 = arith.divf %21, %24 : vector<8x8xf32>
    %cst_19 = arith.constant dense<0.000000e+00> : vector<8x128xf32>
    %26 = tpu.matmul %25, %7, %cst_19 {dimension_numbers = #tpu.dot_dimension_numbers<[1], [0], [0], [1], [0, 0, 1, 1], [], []>} : vector<8x8xf32>, vector<8x128xf32>, vector<8x128xf32> -> vector<8x128xf32>
    %c0_20 = arith.constant 0 : index
    %c0_21 = arith.constant 0 : index
    %27 = vector.load %arg6[%c0_20, %c0_21] : memref<128x128xf32, #tpu.memory_space<vmem>>, vector<128x128xf32>
    %cst_22 = arith.constant dense<0.000000e+00> : vector<8x128xf32>
    %28 = tpu.matmul %26, %27, %cst_22 {dimension_numbers = #tpu.dot_dimension_numbers<[1], [0], [0], [1], [0, 0, 1, 1], [], []>} : vector<8x128xf32>, vector<128x128xf32>, vector<8x128xf32> -> vector<8x128xf32>
    %29 = arith.addf %28, %1 : vector<8x128xf32>
    %cst_23 = arith.constant dense<0.000000e+00> : vector<8xf32>
    %30 = vector.multi_reduction <add>, %29, %cst_23 [1] : vector<8x128xf32> to vector<8xf32>
    %31 = vector.shape_cast %30 : vector<8xf32> to vector<8x1xf32>
    %cst_24 = arith.constant 1.280000e+02 : f32
    %32 = vector.broadcast %cst_24 : f32 to vector<8x1xf32>
    %33 = arith.divf %31, %32 : vector<8x1xf32>
    %34 = vector.broadcast %33 : vector<8x1xf32> to vector<8x128xf32>
    %35 = arith.subf %29, %34 : vector<8x128xf32>
    %36 = arith.mulf %35, %35 : vector<8x128xf32>
    %cst_25 = arith.constant dense<0.000000e+00> : vector<8xf32>
    %37 = vector.multi_reduction <add>, %36, %cst_25 [1] : vector<8x128xf32> to vector<8xf32>
    %38 = vector.shape_cast %37 : vector<8xf32> to vector<8x1xf32>
    %cst_26 = arith.constant 1.280000e+02 : f32
    %39 = vector.broadcast %cst_26 : f32 to vector<8x1xf32>
    %40 = arith.divf %38, %39 : vector<8x1xf32>
    %cst_27 = arith.constant 9.99999997E-7 : f32
    %41 = vector.broadcast %cst_27 : f32 to vector<8x1xf32>
    %42 = arith.addf %40, %41 : vector<8x1xf32>
    %43 = math.rsqrt %42 : vector<8x1xf32>
    %44 = vector.broadcast %43 : vector<8x1xf32> to vector<8x128xf32>
    %45 = arith.mulf %35, %44 : vector<8x128xf32>
    %c0_28 = arith.constant 0 : index
    %c0_29 = arith.constant 0 : index
    %46 = vector.load %arg7[%c0_28, %c0_29] : memref<1x128xf32, #tpu.memory_space<vmem>>, vector<1x128xf32>
    %47 = vector.broadcast %46 : vector<1x128xf32> to vector<8x128xf32>
    %48 = arith.mulf %45, %47 : vector<8x128xf32>
    %c0_30 = arith.constant 0 : index
    %c0_31 = arith.constant 0 : index
    %49 = vector.load %arg8[%c0_30, %c0_31] : memref<1x128xf32, #tpu.memory_space<vmem>>, vector<1x128xf32>
    %50 = vector.broadcast %49 : vector<1x128xf32> to vector<8x128xf32>
    %51 = arith.addf %48, %50 : vector<8x128xf32>
    %c0_32 = arith.constant 0 : index
    %c0_33 = arith.constant 0 : index
    %c0_34 = arith.constant 0 : index
    %52 = vector.load %arg9[%c0_32, %c0_33, %c0_34] : memref<1x8x128xf32, #tpu.memory_space<vmem>>, vector<1x8x128xf32>
    %53 = vector.shape_cast %52 : vector<1x8x128xf32> to vector<8x128xf32>
    %54 = vector.shape_cast %51 : vector<8x128xf32> to vector<1x8x128xf32>
    tpu.vector_store %arg9[%c0_32, %c0_33, %c0_34], %54 {strides = array<i32>} : memref<1x8x128xf32, #tpu.memory_space<vmem>>, vector<1x8x128xf32>,
    %c0_35 = arith.constant 0 : index
    %c0_36 = arith.constant 0 : index
    %c0_37 = arith.constant 0 : index
    %55 = vector.load %arg10[%c0_35, %c0_36, %c0_37] : memref<1x8x8xf32, #tpu.memory_space<vmem>>, vector<1x8x8xf32>
    %56 = vector.shape_cast %55 : vector<1x8x8xf32> to vector<8x8xf32>
    %57 = vector.shape_cast %25 : vector<8x8xf32> to vector<1x8x8xf32>
    tpu.vector_store %arg10[%c0_35, %c0_36, %c0_37], %57 {strides = array<i32>} : memref<1x8x8xf32, #tpu.memory_space<vmem>>, vector<1x8x8xf32>,
    return
  }
  func.func @transform_0(%arg0: i32) -> (i32, i32, i32) {
    %c0_i32 = arith.constant 0 : i32
    %c0_i32_0 = arith.constant 0 : i32
    %c0_i32_1 = arith.constant 0 : i32
    return %arg0, %c0_i32, %c0_i32_0 : i32, i32, i32
  }
  func.func @transform_1(%arg0: i32) -> (i32, i32, i32) {
    %c0_i32 = arith.constant 0 : i32
    %c0_i32_0 = arith.constant 0 : i32
    %c0_i32_1 = arith.constant 0 : i32
    return %arg0, %c0_i32, %c0_i32_0 : i32, i32, i32
  }
  func.func @transform_2(%arg0: i32) -> (i32, i32) {
    %c0_i32 = arith.constant 0 : i32
    %c0_i32_0 = arith.constant 0 : i32
    %c0_i32_1 = arith.constant 0 : i32
    return %c0_i32, %c0_i32_0 : i32, i32
  }
  func.func @transform_3(%arg0: i32) -> (i32, i32) {
    %c0_i32 = arith.constant 0 : i32
    %c0_i32_0 = arith.constant 0 : i32
    %c0_i32_1 = arith.constant 0 : i32
    return %c0_i32, %c0_i32_0 : i32, i32
  }
  func.func @transform_4(%arg0: i32) -> (i32, i32) {
    %c0_i32 = arith.constant 0 : i32
    %c0_i32_0 = arith.constant 0 : i32
    %c0_i32_1 = arith.constant 0 : i32
    return %c0_i32, %c0_i32_0 : i32, i32
  }
  func.func @transform_5(%arg0: i32) -> (i32, i32) {
    %c0_i32 = arith.constant 0 : i32
    %c0_i32_0 = arith.constant 0 : i32
    %c0_i32_1 = arith.constant 0 : i32
    return %c0_i32, %c0_i32_0 : i32, i32
  }
  func.func @transform_6(%arg0: i32) -> (i32, i32) {
    %c0_i32 = arith.constant 0 : i32
    %c0_i32_0 = arith.constant 0 : i32
    %c0_i32_1 = arith.constant 0 : i32
    return %c0_i32, %c0_i32_0 : i32, i32
  }
  func.func @transform_7(%arg0: i32) -> (i32, i32) {
    %c0_i32 = arith.constant 0 : i32
    %c0_i32_0 = arith.constant 0 : i32
    %c0_i32_1 = arith.constant 0 : i32
    return %c0_i32, %c0_i32_0 : i32, i32
  }
  func.func @transform_8(%arg0: i32) -> (i32, i32, i32) {
    %c0_i32 = arith.constant 0 : i32
    %c0_i32_0 = arith.constant 0 : i32
    %c0_i32_1 = arith.constant 0 : i32
    return %arg0, %c0_i32, %c0_i32_0 : i32, i32, i32
  }
  func.func @transform_9(%arg0: i32) -> (i32, i32, i32) {
    %c0_i32 = arith.constant 0 : i32
    %c0_i32_0 = arith.constant 0 : i32
    %c0_i32_1 = arith.constant 0 : i32
    return %arg0, %c0_i32, %c0_i32_0 : i32, i32, i32
  }
}

</mosaic_0001>

<bundles_post_ra>
// kernel: bert4rec_block.2
= control target key start
LH: loop header
LB: loop body
LE: loop exit
PB: predicated region body
PF: predicated region fallthrough
CT: control target
= control target key end

     0   :  { %s2588_s0 = inlined_call_operand.hbm [shape: f32[2,8,128], index: 0, kind: input, shape index: {}]   ;;  %s2589_s1 = inlined_call_operand.hbm [shape: f32[2,8,8], index: 1, kind: input, shape index: {}]   ;;  %s2590_s2 = inlined_call_operand.hbm [shape: f32[128,128], index: 2, kind: input, shape index: {}]   ;;  %s2591_s3 = inlined_call_operand.hbm [shape: f32[128,128], index: 3, kind: input, shape index: {}]   ;;  %s2592_s4 = inlined_call_operand.hbm [shape: f32[128,128], index: 4, kind: input, shape index: {}]   ;;  %s2593_s5 = inlined_call_operand.hbm [shape: f32[128,128], index: 5, kind: input, shape index: {}]   ;;  %s2594_s6 = inlined_call_operand.hbm [shape: f32[1,128], index: 6, kind: input, shape index: {}]   ;;  %s2595_s7 = inlined_call_operand.hbm [shape: f32[1,128], index: 7, kind: input, shape index: {}]   ;;  %s2596_s8 = inlined_call_operand.hbm [shape: f32[2,8,128], index: 8, kind: output, shape index: {0}]   ;;  %s2597_s9 = inlined_call_operand.hbm [shape: f32[2,8,8], index: 9, kind: output, shape index: {1}]  }
   0x1   :  { %2603 = sst [smem:[#allocation27_spill]] %s2590_s2 }
   0x2   :  { %2604 = sst [smem:[#allocation28_spill]] %s2591_s3 }
   0x3   :  { %2605 = sst [smem:[#allocation29_spill]] %s2592_s4 }
   0x4   :  { %2606 = sst [smem:[#allocation30_spill]] %s2593_s5 }
   0x5   :  { %2607 = sst [smem:[#allocation31_spill]] %s2594_s6 }
   0x6   :  { %2608 = sst [smem:[#allocation32_spill]] %s2596_s8 }
   0x7   :  { %15 = vsyncpa [#allocation3], 0 }
   0x8   :  { %17 = vsyncpa [#allocation3 + $0x1], 0 }
   0x9   :  { %18 = vsyncpa [#allocation6], 0 }
   0xa   :  { %20 = vsyncpa [#allocation6 + $0x1], 0 }
   0xb   :  { %21 = vsyncpa [#allocation9], 0 }
   0xc   :  { %22 = vsyncpa [#allocation12], 0 }
   0xd   :  { %23 = vsyncpa [#allocation15], 0 }
   0xe   :  { %24 = vsyncpa [#allocation4], 0 }
   0xf   :  { %26 = vsyncpa [#allocation4 + $0x1], 0 }
  0x10   :  { %27 = vsyncpa [#allocation18], 0 }
  0x11   :  { %29 = vsyncpa [#allocation18 + $0x1], 0  ;;  %s2119_s30 = smov 0   ;;  %s2121_s10 = smov 0  }
  0x12   :  { %s2123_s11 = smov 0   ;;  %s2125_s12 = smov 0  }
  0x13 LB: > { %s2054_s13 = smov [#allocation7]   ;;  %s2140_s15 = sadd.s32 4294967295, %s2052_s12   ;;  %s2052_s12 = sphi %s2125_s12, %s2640_s12   ;;  %s2048_s11 = sphi %s2123_s11, %s2639_s11   ;;  %s2044_s10 = sphi %s2121_s10, %s2638_s10   ;;  %s2040_s30 = sphi %s2119_s30, %s2637_s30  }
  0x14   : > { %s282_s14 = sshll.u32 %s2054_s13, 4  ;;  %p1228_p0 = scmp.ge.s32.totalorder %s2052_s12, 1  ;;  %s2145_s14 = int_to_ptr.vmem [resolvable:$true] %s282_s14 }
  0x15   : > { %p2599_p1 = scmp.eq.s32.totalorder %s2140_s15, 0  ;;  %p270_p2 = scmp.lt.s32.totalorder %s2052_s12, 3 }
  0x16   : > { %s2055_s17 = smov [#allocation8]   ;;  %s2056_s20 = smov [#allocation11]  }
  0x17   : > { %p2147_p3 = pnand %p1228_p0, %p270_p2  ;;  %s295_s18 = sshll.u32 %s2055_s17, 4  ;;  %s2160_s18 = int_to_ptr.vmem [resolvable:$true] %s295_s18 }
  0x18   : > { %s321_s21 = sshll.u32 %s2056_s20, 4  ;;  %s2611_s2 = sld [smem:[#allocation27_spill]]  ;;  %s2162_s21 = int_to_ptr.vmem [resolvable:$true] %s321_s21 }
  0x19   : > { %s2609_s16 = scalar_select %p2147_p3, 1, 0 }
  0x1a   : > { %p1610_p5 = pneg %p2147_p3 }
  0x1c   : > { %p2156_p6 = pnand %p1610_p5, %p2599_p1 }
  0x1e   : > { %s1706_s24 = scalar_lea.hbm %s2611_s2, 2048  ;;  %p2172_p8 = pneg %p2156_p6 }
  0x1f   : > { %p1707_p7 = scmp.ne.s32.totalorder %s2611_s2, %s1706_s24  ;;  %p1713_p11 = scmp.lt.u32.totalorder %s1706_s24, %s2611_s2 }
  0x21   : > { %p1709_p9 = pnand %p2172_p8, %p1707_p7 }
  0x23   : > { %p1710_p10 = pneg %p1709_p9 }
  0x25   : > { %p1715_p12 = pnand %p1713_p11, %p1710_p10 }
  0x27   : > { %1718 = shalt.err (!%p1715_p12)
}
  0x28   : > { %s1719_s13 = scalar_lea.vmem %s2145_s14, 2048  ;;  %p1727_p5 = scmp.lt.s32.totalorder %s2145_s14, %s2145_s14 }
  0x29   : > { %p1720_p13 = scmp.ne.s32.totalorder %s2145_s14, %s1719_s13  ;;  %p1728_p4 = scmp.lt.s32.totalorder %s1719_s13, %s1719_s13 }
  0x2b   : > { %p1722_p0 = pnand %p1720_p13, %p2172_p8  ;;  %p1729_p7 = por %p1728_p4, %p1727_p5 }
  0x2d   : > { %p1723_p2 = pneg %p1722_p0 }
  0x2f   : > { %p1730_p9 = pnand %p1729_p7, %p1723_p2 }
  0x31   : > { %1733 = shalt.err (!%p1730_p9)
}
  0x32   : > { %s2057_s17 = smov 128   ;;  %s2058_s20 = smov 8  }
  0x33   : > { %1613 = dma.hbm_to_vmem [thread:$0]  (!%p2156_p6), %s2611_s2, 2048, %s2145_s14, [#allocation6], %s2057_s17, %s2057_s17, %s2058_s20  }
  0x34   : > { %s2613_s3 = sld [smem:[#allocation28_spill]] }
  0x3a   : > { %s1734_s26 = scalar_lea.hbm %s2613_s3, 2048 }
  0x3b   : > { %p1735_p4 = scmp.ne.s32.totalorder %s2613_s3, %s1734_s26  ;;  %p1741_p12 = scmp.lt.u32.totalorder %s1734_s26, %s2613_s3 }
  0x3d   : > { %p1737_p10 = pnand %p1735_p4, %p2172_p8 }
  0x3f   : > { %p1738_p11 = pneg %p1737_p10 }
  0x41   : > { %p1743_p13 = pnand %p1741_p12, %p1738_p11 }
  0x43   : > { %1746 = shalt.err (!%p1743_p13)
}
  0x44   : > { %s1747_s14 = scalar_lea.vmem %s2160_s18, 2048  ;;  %p1755_p7 = scmp.lt.s32.totalorder %s2160_s18, %s2160_s18 }
  0x45   : > { %p1748_p0 = scmp.ne.s32.totalorder %s2160_s18, %s1747_s14  ;;  %p1756_p9 = scmp.lt.s32.totalorder %s1747_s14, %s1747_s14 }
  0x47   : > { %p1750_p2 = pnand %p1748_p0, %p2172_p8  ;;  %p1757_p4 = por %p1756_p9, %p1755_p7 }
  0x49   : > { %p1751_p5 = pneg %p1750_p2 }
  0x4b   : > { %p1758_p10 = pnand %p1757_p4, %p1751_p5 }
  0x4d   : > { %1761 = shalt.err (!%p1758_p10)
}
  0x4e   : > { %1616 = dma.hbm_to_vmem [thread:$0]  (!%p2156_p6), %s2613_s3, 2048, %s2160_s18, [#allocation9], %s2057_s17, %s2057_s17, %s2058_s20  }
  0x4f   : > { %s2614_s5 = sld [smem:[#allocation30_spill]] }
  0x55   : > { %s1762_s25 = scalar_lea.hbm %s2614_s5, 2048 }
  0x56   : > { %p1763_p11 = scmp.ne.s32.totalorder %s2614_s5, %s1762_s25  ;;  %p1769_p0 = scmp.lt.u32.totalorder %s1762_s25, %s2614_s5 }
  0x58   : > { %p1765_p12 = pnand %p1763_p11, %p2172_p8 }
  0x5a   : > { %p1766_p13 = pneg %p1765_p12 }
  0x5c   : > { %p1771_p2 = pnand %p1769_p0, %p1766_p13 }
  0x5e   : > { %1774 = shalt.err (!%p1771_p2)
}
  0x5f   : > { %s1775_s18 = scalar_lea.vmem %s2162_s21, 2048  ;;  %p1783_p4 = scmp.lt.s32.totalorder %s2162_s21, %s2162_s21 }
  0x60   : > { %p1776_p5 = scmp.ne.s32.totalorder %s2162_s21, %s1775_s18  ;;  %p1784_p10 = scmp.lt.s32.totalorder %s1775_s18, %s1775_s18 }
  0x62   : > { %p1778_p7 = pnand %p1776_p5, %p2172_p8  ;;  %p1785_p11 = por %p1784_p10, %p1783_p4 }
  0x64   : > { %p1779_p9 = pneg %p1778_p7 }
  0x66   : > { %p1786_p12 = pnand %p1785_p11, %p1779_p9 }
  0x68   : > { %1789 = shalt.err (!%p1786_p12)
}
  0x69   : > { %1622 = dma.hbm_to_vmem [thread:$0]  (!%p2156_p6), %s2614_s5, 2048, %s2162_s21, [#allocation12], %s2057_s17, %s2057_s17, %s2058_s20  }
  0x6a   : > { %s2059_s22 = smov [#allocation10]   ;;  %s2060_s24 = smov [#allocation13]  }
  0x6b   : > { %s308_s23 = sshll.u32 %s2059_s22, 4  ;;  %s335_s25 = sshll.u32 %s2060_s24, 4  ;;  %s309_s23 = int_to_ptr.vmem [resolvable:$true] %s308_s23  ;;  %s336_s25 = int_to_ptr.vmem [resolvable:$true] %s335_s25 }
  0x6c   : > { %s2615_s4 = sld [smem:[#allocation29_spill]] }
  0x72   : > { %s1790_s29 = scalar_lea.hbm %s2615_s4, 2048 }
  0x73   : > { %p1791_p13 = scmp.ne.s32.totalorder %s2615_s4, %s1790_s29  ;;  %p1797_p5 = scmp.lt.u32.totalorder %s1790_s29, %s2615_s4 }
  0x75   : > { %p1793_p0 = pnand %p1791_p13, %p2172_p8 }
  0x77   : > { %p1794_p2 = pneg %p1793_p0 }
  0x79   : > { %p1799_p7 = pnand %p1797_p5, %p1794_p2 }
  0x7b   : > { %1802 = shalt.err (!%p1799_p7)
}
  0x7c   : > { %s1803_s21 = scalar_lea.vmem %s309_s23, 2048  ;;  %p1811_p11 = scmp.lt.s32.totalorder %s309_s23, %s309_s23 }
  0x7d   : > { %p1804_p9 = scmp.ne.s32.totalorder %s309_s23, %s1803_s21  ;;  %p1812_p12 = scmp.lt.s32.totalorder %s1803_s21, %s1803_s21 }
  0x7f   : > { %p1806_p4 = pnand %p1804_p9, %p2172_p8  ;;  %p1813_p1 = por %p1812_p12, %p1811_p11 }
  0x81   : > { %p1807_p10 = pneg %p1806_p4 }
  0x83   : > { %p1814_p3 = pnand %p1813_p1, %p1807_p10 }
  0x85   : > { %1817 = shalt.err (!%p1814_p3)
}
  0x86   : > { %1619 = dma.hbm_to_vmem [thread:$0]  (!%p2156_p6), %s2615_s4, 2048, %s309_s23, [#allocation9], %s2057_s17, %s2057_s17, %s2058_s20  }
  0x87   : > { %s2616_s6 = sld [smem:[#allocation31_spill]] }
  0x8d   : > { %s1818_s26 = scalar_lea.hbm %s2616_s6, 16 }
  0x8e   : > { %p1819_p1 = scmp.ne.s32.totalorder %s2616_s6, %s1818_s26  ;;  %p1825_p0 = scmp.lt.u32.totalorder %s1818_s26, %s2616_s6 }
  0x90   : > { %p1821_p3 = pnand %p1819_p1, %p2172_p8 }
  0x92   : > { %p1822_p13 = pneg %p1821_p3 }
  0x94   : > { %p1827_p2 = pnand %p1825_p0, %p1822_p13 }
  0x96   : > { %1830 = shalt.err (!%p1827_p2)
}
  0x97   : > { %s1831_s14 = scalar_lea.vmem %s336_s25, 16  ;;  %s1838_s17 = scalar_lea.vmem %s336_s25, 32 }
  0x98   : > { %p1832_p5 = scmp.ne.s32.totalorder %s336_s25, %s1831_s14  ;;  %p1839_p4 = scmp.lt.s32.totalorder %s336_s25, %s336_s25 }
  0x99   : > { %p1840_p10 = scmp.lt.s32.totalorder %s1838_s17, %s1831_s14 }
  0x9a   : > { %p1834_p7 = pnand %p1832_p5, %p2172_p8 }
  0x9b   : > { %p1841_p11 = por %p1840_p10, %p1839_p4 }
  0x9c   : > { %p1835_p9 = pneg %p1834_p7 }
  0x9e   : > { %p1842_p12 = pnand %p1841_p11, %p1835_p9 }
  0xa0   : > { %1845 = shalt.err (!%p1842_p12)
}
  0xa1   : > { %1625 = dma.hbm_to_vmem [thread:$0]  (!%p2156_p6), %s2616_s6, 16, %s336_s25, [#allocation12]  }
  0xa2   : > { %s2061_s21 = smov [#allocation14]   ;;  %s1846_s24 = scalar_lea.hbm %s2595_s7, 16 }
  0xa3   : > { %s346_s2 = sshll.u32 %s2061_s21, 4  ;;  %p1847_p1 = scmp.ne.s32.totalorder %s2595_s7, %s1846_s24  ;;  %s347_s2 = int_to_ptr.vmem [resolvable:$true] %s346_s2 }
  0xa4   : > { %p1853_p0 = scmp.lt.u32.totalorder %s1846_s24, %s2595_s7 }
  0xa5   : > { %p1849_p3 = pnand %p1847_p1, %p2172_p8 }
  0xa7   : > { %p1850_p13 = pneg %p1849_p3 }
  0xa9   : > { %p1855_p2 = pnand %p1853_p0, %p1850_p13 }
  0xab   : > { %1858 = shalt.err (!%p1855_p2)
}
  0xac   : > { %s1859_s25 = scalar_lea.vmem %s347_s2, 16  ;;  %s1866_s18 = scalar_lea.vmem %s347_s2, 32 }
  0xad   : > { %p1860_p5 = scmp.ne.s32.totalorder %s347_s2, %s1859_s25  ;;  %p1867_p4 = scmp.lt.s32.totalorder %s347_s2, %s347_s2 }
  0xae   : > { %p1868_p10 = scmp.lt.s32.totalorder %s1866_s18, %s1859_s25 }
  0xaf   : > { %p1862_p7 = pnand %p1860_p5, %p2172_p8 }
  0xb0   : > { %p1869_p11 = por %p1868_p10, %p1867_p4 }
  0xb1   : > { %p1863_p9 = pneg %p1862_p7 }
  0xb3   : > { %p1870_p12 = pnand %p1869_p11, %p1863_p9 }
  0xb5   : > { %1873 = shalt.err (!%p1870_p12)
}
  0xb6   : > { %1628 = dma.hbm_to_vmem [thread:$0]  (!%p2156_p6), %s2595_s7, 16, %s347_s2, [#allocation15]  }
  0xb7   : > { %s1227_s27 = sadd.s32 4294967294, %s2052_s12   ;;  %s2307_s19 = sadd.s32 1, %s2052_s12  }
  0xb8   : > { %s39_s20 = ssub.s32 %s2052_s12, %s2307_s19  ;;  %s42_s23 = sadd.s32 1, %s2048_s11 }
  0xb9   : > { %p40_p8 = scmp.eq.s32.totalorder %s39_s20, 0  ;;  %p49_p1 = scmp.ne.s32.totalorder %s2048_s11, %s2044_s10 }
  0xba   : > { %p50_p3 = scmp.eq.s32.totalorder %s2052_s12, 0  ;;  %p55_p13 = scmp.ne.s32.totalorder %s2044_s10, %s2040_s30 }
  0xbb   : > { %s2318_s21 = scalar_select %p40_p8, %s2048_s11, %s42_s23  }
  0xbc   : > { %p2320_p0 = por %p50_p3, %p49_p1  ;;  %p2618_p2 = scmp.eq.s32.totalorder %s2140_s15, 0 }
  0xbd   : > { %p231_p5 = scmp.eq.s32.totalorder %s2140_s15, 1  ;;  %p237_p7 = scmp.eq.s32.totalorder %s1227_s27, 1 }
  0xbe   : > { %p2326_p6 = por %p2618_p2, %p55_p13  ;;  %p1649_p9 = scmp.lt.s32.totalorder %s2052_s12, 2 }
  0xbf   : > { %s357_s22 = sand.u32 1, %s2048_s11   ;;  %p2333_p4 = por %p231_p5, %p49_p1 }
  0xc0   : > { %s2619_s2 = scalar_select %p2326_p6, 1, 0 }
  0xc1   : > { %s2620_s24 = scalar_select %p2333_p4, 1, 0 }
  0xc2   : > { %p2337_p10 = por %p237_p7, %p55_p13  ;;  %s2341_s28 = sshll.u32 %s357_s22, 3 }
  0xc3   : > { %s1237_s29 = sshll.u32 %s2052_s12, 7  ;;  %s361_s14 = scalar_lea.vmem [#allocation2], %s2341_s28 }
  0xc4   : > { %s2621_s26 = scalar_select %p2337_p10, 1, 0 }
  0xc5   : > { %s2347_s18 = scalar_lea.hbm %s2588_s0, %s1237_s29  ;;  %s368_s17 = sshll.u32 %s361_s14, 4  ;;  %s2350_s17 = int_to_ptr.vmem [resolvable:$true] %s368_s17 }
  0xc6   : > { %p2354_p11 = pnand %p1649_p9, %p2320_p0  ;;  %s2361_s13 = scalar_lea.hbm %s2589_s1, %s1237_s29 }
  0xc7   : > { %s375_s25 = sand.u32 1, %s2052_s12   ;;  %s358_s3 = scalar_lea.sflag [#allocation3], %s357_s22 }
  0xc8   : > { %s1874_s4 = scalar_lea.hbm %s2347_s18, 128  ;;  %p1876_p8 = pneg %p2354_p11 }
  0xc9   : > { %p1875_p12 = scmp.ne.s32.totalorder %s2347_s18, %s1874_s4  ;;  %s1879_s5 = scalar_lea.hbm %s2588_s0, 256 }
  0xca   : > { %p1880_p13 = scmp.lt.u32.totalorder %s2347_s18, %s2588_s0  ;;  %p1881_p0 = scmp.lt.u32.totalorder %s1879_s5, %s1874_s4 }
  0xcb   : > { %p1877_p1 = pnand %p1876_p8, %p1875_p12  ;;  %p1883_p5 = scmp.lt.u32.totalorder %s1874_s4, %s2347_s18 }
  0xcc   : > { %p1882_p2 = por %p1881_p0, %p1880_p13 }
  0xcd   : > { %p1878_p3 = pneg %p1877_p1 }
  0xce   : > { %p1884_p7 = por %p1883_p5, %p1882_p2 }
  0xd0   : > { %p1885_p9 = pnand %p1884_p7, %p1878_p3 }
  0xd2   : > { %1888 = shalt.err (!%p1885_p9)
}
  0xd3   : > { %s1889_s22 = scalar_lea.vmem %s2350_s17, 128  ;;  %s2062_s29 = smov [#allocation2]  }
  0xd4   : > { %p1890_p12 = scmp.ne.s32.totalorder %s2350_s17, %s1889_s22  ;;  %s1894_s23 = sshll.u32 %s2062_s29, 4  ;;  %s1895_s23 = int_to_ptr.vmem [resolvable:$false] %s1894_s23 }
  0xd5   : > { %s1896_s6 = scalar_lea.vmem %s1895_s23, 256  ;;  %p1897_p4 = scmp.lt.s32.totalorder %s2350_s17, %s1895_s23 }
  0xd6   : > { %p1892_p1 = pnand %p1890_p12, %p1876_p8  ;;  %p1898_p13 = scmp.lt.s32.totalorder %s1896_s6, %s1889_s22 }
  0xd8   : > { %p1893_p10 = pneg %p1892_p1  ;;  %p1899_p0 = por %p1898_p13, %p1897_p4 }
  0xda   : > { %p1900_p2 = pnand %p1899_p0, %p1893_p10 }
  0xdc   : > { %1903 = shalt.err (!%p1900_p2)
}
  0xdd   : > { %1632 = dma.hbm_to_vmem [thread:$0]  (!%p2354_p11), %s2347_s18, 128, %s2350_s17, %s358_s3  }
  0xde   : > { %s379_s4 = scalar_lea.vmem [#allocation5], %s2341_s28  ;;  %s376_s8 = scalar_lea.sflag [#allocation6], %s375_s25 }
  0xdf   : > { %s386_s5 = sshll.u32 %s379_s4, 4  ;;  %s1904_s14 = scalar_lea.hbm %s2361_s13, 128  ;;  %s387_s5 = int_to_ptr.vmem [resolvable:$true] %s386_s5 }
  0xe0   : > { %p1905_p4 = scmp.ne.s32.totalorder %s2361_s13, %s1904_s14  ;;  %s1909_s29 = scalar_lea.hbm %s2589_s1, 256 }
  0xe1   : > { %p1910_p5 = scmp.lt.u32.totalorder %s2361_s13, %s2589_s1  ;;  %p1911_p7 = scmp.lt.u32.totalorder %s1909_s29, %s1904_s14 }
  0xe2   : > { %p1907_p10 = pnand %p1905_p4, %p1876_p8  ;;  %p1913_p12 = scmp.lt.u32.totalorder %s1904_s14, %s2361_s13 }
  0xe3   : > { %p1912_p9 = por %p1911_p7, %p1910_p5 }
  0xe4   : > { %p1908_p3 = pneg %p1907_p10 }
  0xe5   : > { %p1914_p1 = por %p1913_p12, %p1912_p9 }
  0xe7   : > { %p1915_p13 = pnand %p1914_p1, %p1908_p3 }
  0xe9   : > { %1918 = shalt.err (!%p1915_p13)
}
  0xea   : > { %s1919_s3 = scalar_lea.vmem %s387_s5, 128  ;;  %s2063_s28 = smov [#allocation5]  }
  0xeb   : > { %p1920_p0 = scmp.ne.s32.totalorder %s387_s5, %s1919_s3  ;;  %s1924_s18 = sshll.u32 %s2063_s28, 4  ;;  %s1925_s18 = int_to_ptr.vmem [resolvable:$false] %s1924_s18 }
  0xec   : > { %s1926_s17 = scalar_lea.vmem %s1925_s18, 256  ;;  %p1927_p10 = scmp.lt.s32.totalorder %s387_s5, %s1925_s18 }
  0xed   : > { %p1922_p2 = pnand %p1920_p0, %p1876_p8  ;;  %p1928_p6 = scmp.lt.s32.totalorder %s1926_s17, %s1919_s3 }
  0xef   : > { %p1923_p4 = pneg %p1922_p2  ;;  %p1929_p5 = por %p1928_p6, %p1927_p10 }
  0xf1   : > { %p1930_p7 = pnand %p1929_p5, %p1923_p4 }
  0xf3   : > { %1933 = shalt.err (!%p1930_p7)
}
  0xf4   : > { %1635 = dma.hbm_to_vmem [thread:$0]  (!%p2354_p11), %s2361_s13, 128, %s387_s5, %s376_s8  }
  0xf5   : > { %p2623_p3 = scmp.ne.s32.totalorder %s2609_s16, 0 }
  0xf6   : > { %s2414_s25 = sand.u32 (!%p2623_p3), 1, %s2044_s10   ;;  %p2624_p6 = scmp.ne.s32.totalorder (!%p2623_p3), %s2619_s2, 0 }
  0xf7   : > { %395 = sbr.rel (%p2623_p3) target bundleno = 1800 (0x708), region = 52  ;;  %s2417_s4 = sshll.u32 (!%p2623_p3), %s2414_s25, 3 }
  0xf8   : > { %s398_s14 = scalar_lea.sflag (!%p2623_p3), [#allocation3], %s2414_s25  ;;  %s401_s20 = scalar_lea.vmem (!%p2623_p3), [#allocation2], %s2417_s4 }
  0xfe   : > { %2007 = dma.done.wait (%p2624_p6), %s398_s14, 128  }
  0xff   : > { %2009 = vsyncadd (%p2624_p6), %s398_s14, 4294967168  ;;  %s406_s16 = sand.u32 1, %s2140_s15   ;;  %s410_s13 = scalar_lea.vmem [#allocation5], %s2417_s4 }
 0x100   : > { %s407_s27 = scalar_lea.sflag [#allocation6], %s406_s16 }
 0x101   : > { %2011 = dma.done.wait (%p2624_p6), %s407_s27, 128  }
 0x102   : > { %2013 = vsyncadd (%p2624_p6), %s407_s27, 4294967168  ;;  %p2625_p11 = scmp.eq.s32.totalorder %s2140_s15, 0 }
 0x104   : > { %2015 = dma.done.wait (%p2625_p11), [#allocation6], 2048   ;;  %p2626_p8 = pmov %p2625_p11 }
 0x106   : > { %2017 = vsyncadd (%p2626_p8), [#allocation6], 4294965248  ;;  %p2627_p9 = pmov %p2626_p8 }
 0x107   : > { %p2628_p12 = pmov %p2626_p8 }
 0x108   : > { %2019 = dma.done.wait (%p2627_p9), [#allocation9], 4096  }
 0x109   : > { %2021 = vsyncadd (%p2628_p12), [#allocation9], 4294963200  ;;  %p2629_p1 = pmov %p2626_p8 }
 0x10b   : > { %2023 = dma.done.wait (%p2629_p1), [#allocation12], 2064   ;;  %p2630_p13 = pmov %p2629_p1 }
 0x10c   : > { %p2631_p0 = pmov %p2629_p1 }
 0x10d   : > { %2025 = vsyncadd (%p2630_p13), [#allocation12], 4294965232 }
 0x10e   : > { %2027 = dma.done.wait (%p2631_p0), [#allocation15], 16   ;;  %p2632_p2 = pmov %p2631_p0 }
 0x10f   : > { %v2064_v0 = vmov 0.0|0.0   ;;  %vm2065_vm0 = vmmov 0   ;;  %v2066_v1 = vmov 0.0   ;;  %v566_v2 = vld [vmem:[#allocation8] sm:$0xff]  ;;  %v567_v3 = vld [vmem:[#allocation8 + $0x8] sm:$0xff]  ;;  %v568_v7 = vld [vmem:[#allocation8 + $0x10] sm:$0xff] }
 0x110   : > { %2029 = vsyncadd (%p2632_p2), [#allocation15], 4294967280  ;;  %1506 = vmatprep.subr.bf16.mxu1 %v2064_v0  ;;  %1482 = vmatprep.subr.bf16.mxu0 %v2064_v0  ;;  %v480_v4 = vld [vmem:[#allocation7] sm:$0xff]  ;;  %v1507_v5 = vpack.c.bf16 %v567_v3, %v566_v2  ;;  %v481_v6 = vld [vmem:[#allocation7 + $0x8] sm:$0xff]  ;;  %vm812_vm2 = vcmask 64512   ;;  %s478_s2 = scalar_lea.vmem [#allocation17], %s2417_s4 }
 0x111   : > { %1399 = vmatprep.mubr.msk.f32.mxu1 %vm2065_vm0, %v2066_v1  ;;  %1364 = vmatprep.mubr.msk.f32.mxu0 %vm2065_vm0, %v2066_v1  ;;  %v569_v8 = vld [vmem:[#allocation8 + $0x18] sm:$0xff]  ;;  %v1483_v9 = vpack.c.bf16 %v481_v6, %v480_v4  ;;  %v482_v10 = vld [vmem:[#allocation7 + $0x10] sm:$0xff]  ;;  %v570_v14 = vld [vmem:[#allocation8 + $0x20] sm:$0xff]  ;;  %s1256_s5 = sshll.u32 %s2140_s15, 7  ;;  %s1045_s23 = sshll.u32 %s478_s2, 4  ;;  %s1046_s23 = int_to_ptr.vmem [resolvable:$true] %s1045_s23 }
 0x112   : > { %v483_v11 = vld [vmem:[#allocation7 + $0x18] sm:$0xff]  ;;  %1508 = vmatpush3.bf16.msra.mxu1 %v1507_v5  ;;  %v1510_v12 = vpack.c.bf16 %v569_v8, %v568_v7  ;;  %v571_v15 = vld [vmem:[#allocation8 + $0x28] sm:$0xff]  ;;  %v484_v16 = vld [vmem:[#allocation7 + $0x20] sm:$0xff]  ;;  %s2516_s29 = scalar_lea.hbm %s2597_s9, %s1256_s5  ;;  %s1019_s6 = scalar_lea.sflag [#allocation18], %s2414_s25 }
 0x113   : > { %1484 = vmatpush3.bf16.msra.mxu0 %v1483_v9  ;;  %1509 = vmatprep.subr.bf16.mxu1 %v2064_v0  ;;  %v1486_v13 = vpack.c.bf16 %v483_v11, %v482_v10  ;;  %v485_v17 = vld [vmem:[#allocation7 + $0x28] sm:$0xff]  ;;  %v1513_v18 = vpack.c.bf16 %v571_v15, %v570_v14  ;;  %v572_v20 = vld [vmem:[#allocation8 + $0x30] sm:$0xff]  ;;  %v573_v21 = vld [vmem:[#allocation8 + $0x38] sm:$0xff]  ;;  %s1934_s3 = scalar_lea.vmem %s1046_s23, 128  ;;  %p2633_p10 = scmp.ne.s32.totalorder %s2620_s24, 0 }
 0x114   : > { %1485 = vmatprep.subr.bf16.mxu0 %v2064_v0  ;;  %v1489_v19 = vpack.c.bf16 %v485_v17, %v484_v16  ;;  %v486_v22 = vld [vmem:[#allocation7 + $0x30] sm:$0xff]  ;;  %v487_v23 = vld [vmem:[#allocation7 + $0x38] sm:$0xff]  ;;  %v1516_v24 = vpack.c.bf16 %v573_v21, %v572_v20  ;;  %v574_v26 = vld [vmem:[#allocation8 + $0x40] sm:$0xff]  ;;  %p1935_p4 = scmp.ne.s32.totalorder %s1046_s23, %s1934_s3  ;;  %s2067_s28 = smov [#allocation17]  }
 0x115   : > { %v1492_v25 = vpack.c.bf16 %v487_v23, %v486_v22  ;;  %v575_v27 = vld [vmem:[#allocation8 + $0x48] sm:$0xff]  ;;  %v488_v28 = vld [vmem:[#allocation7 + $0x40] sm:$0xff]  ;;  %v576_v32 = vld [vmem:[#allocation8 + $0x50] sm:$0xff]  ;;  %s1938_s18 = sshll.u32 %s2067_s28, 4  ;;  %s1939_s18 = int_to_ptr.vmem [resolvable:$false] %s1938_s18 }
 0x116   : > { %1511 = vmatpush3.bf16.msra.mxu1 %v1510_v12  ;;  %v489_v29 = vld [vmem:[#allocation7 + $0x48] sm:$0xff]  ;;  %v1519_v30 = vpack.c.bf16 %v575_v27, %v574_v26  ;;  %v577_v33 = vld [vmem:[#allocation8 + $0x58] sm:$0xff]  ;;  %v490_v34 = vld [vmem:[#allocation7 + $0x50] sm:$0xff]  ;;  %p1936_p5 = pnand %p1935_p4, %p2633_p10  ;;  %s1940_s17 = scalar_lea.vmem %s1939_s18, 256 }
 0x117   : > { %1487 = vmatpush3.bf16.msra.mxu0 %v1486_v13  ;;  %1512 = vmatprep.subr.bf16.mxu1 %v2064_v0  ;;  %v1495_v31 = vpack.c.bf16 %v489_v29, %v488_v28  ;;  %v491_v35 = vld [vmem:[#allocation7 + $0x58] sm:$0xff]  ;;  %v1522_v36 = vpack.c.bf16 %v577_v33, %v576_v32  ;;  %v578_v38 = vld [vmem:[#allocation8 + $0x60] sm:$0xff]  ;;  %v579_v39 = vld [vmem:[#allocation8 + $0x68] sm:$0xff]  ;;  %p1941_p3 = scmp.lt.s32.totalorder %s1046_s23, %s1939_s18  ;;  %p1942_p6 = scmp.lt.s32.totalorder %s1940_s17, %s1934_s3 }
 0x118   : > { %1488 = vmatprep.subr.bf16.mxu0 %v2064_v0  ;;  %v1498_v37 = vpack.c.bf16 %v491_v35, %v490_v34  ;;  %v492_v40 = vld [vmem:[#allocation7 + $0x60] sm:$0xff]  ;;  %v493_v41 = vld [vmem:[#allocation7 + $0x68] sm:$0xff]  ;;  %v1525_v42 = vpack.c.bf16 %v579_v39, %v578_v38  ;;  %v580_v44 = vld [vmem:[#allocation8 + $0x70] sm:$0xff]  ;;  %p1937_p7 = pneg %p1936_p5 }
 0x119   : > { %v1501_v43 = vpack.c.bf16 %v493_v41, %v492_v40  ;;  %v581_v45 = vld [vmem:[#allocation8 + $0x78] sm:$0xff]  ;;  %v494_v46 = vld [vmem:[#allocation7 + $0x70] sm:$0xff]  ;;  %v652_v50 = vld [vmem:[#allocation10] sm:$0xff]  ;;  %p1943_p11 = por %p1942_p6, %p1941_p3 }
 0x11a   : > { %1514 = vmatpush3.bf16.msra.mxu1 %v1513_v18  ;;  %v495_v47 = vld [vmem:[#allocation7 + $0x78] sm:$0xff]  ;;  %v1528_v48 = vpack.c.bf16 %v581_v45, %v580_v44  ;;  %v653_v51 = vld [vmem:[#allocation10 + $0x8] sm:$0xff]  ;;  %v654_v54 = vld [vmem:[#allocation10 + $0x10] sm:$0xff] }
 0x11b   : > { %1490 = vmatpush3.bf16.msra.mxu0 %v1489_v19  ;;  %1515 = vmatprep.subr.bf16.mxu1 %v2064_v0  ;;  %v1504_v49 = vpack.c.bf16 %v495_v47, %v494_v46  ;;  %v2469_v52 = vld [vmem:[%s401_s20] sm:$0xff]  ;;  %v1531_v53 = vpack.c.bf16 %v653_v51, %v652_v50  ;;  %v655_v55 = vld [vmem:[#allocation10 + $0x18] sm:$0xff]  ;;  %v658_v60 = vld [vmem:[#allocation10 + $0x30] sm:$0xff]  ;;  %p1944_p8 = pnand %p1943_p11, %p1937_p7 }
 0x11c   : > { %1491 = vmatprep.subr.bf16.mxu0 %v2064_v0  ;;  %v1534_v56 = vpack.c.bf16 %v655_v55, %v654_v54  ;;  %v656_v57 = vld [vmem:[#allocation10 + $0x20] sm:$0xff]  ;;  %v657_v58 = vld [vmem:[#allocation10 + $0x28] sm:$0xff]  ;;  %v659_v61 = vld [vmem:[#allocation10 + $0x38] sm:$0xff] }
 0x11d   : > { %v1537_v59 = vpack.c.bf16 %v657_v58, %v656_v57  ;;  %v1540_v62 = vpack.c.bf16 %v659_v61, %v658_v60  ;;  %v660_v63 = vld [vmem:[#allocation10 + $0x40] sm:$0xff]  ;;  %v661_v2 = vld [vmem:[#allocation10 + $0x48] sm:$0xff]  ;;  %v662_v4 = vld [vmem:[#allocation10 + $0x50] sm:$0xff] }
 0x11e   : > { %1517 = vmatpush3.bf16.msra.mxu1 %v1516_v24  ;;  %v1543_v3 = vpack.c.bf16 %v661_v2, %v660_v63  ;;  %v663_v5 = vld [vmem:[#allocation10 + $0x58] sm:$0xff]  ;;  %v664_v7 = vld [vmem:[#allocation10 + $0x60] sm:$0xff]  ;;  %v665_v8 = vld [vmem:[#allocation10 + $0x68] sm:$0xff] }
 0x11f   : > { %1493 = vmatpush3.bf16.msra.mxu0 %v1492_v25  ;;  %1518 = vmatprep.subr.bf16.mxu1 %v2064_v0  ;;  %v1546_v6 = vpack.c.bf16 %v663_v5, %v662_v4  ;;  %v1549_v9 = vpack.c.bf16 %v665_v8, %v664_v7  ;;  %v666_v10 = vld [vmem:[#allocation10 + $0x70] sm:$0xff]  ;;  %v667_v11 = vld [vmem:[#allocation10 + $0x78] sm:$0xff]  ;;  %v898_v32 = vld [vmem:[#allocation11 + $0x8] sm:$0xff] }
 0x120   : > { %1494 = vmatprep.subr.bf16.mxu0 %v2064_v0  ;;  %v1552_v12 = vpack.c.bf16 %v667_v11, %v666_v10  ;;  %v809_v19 = vld [vmem:[%s410_s13] sm:$0xff]  ;;  %v901_v39 = vld [vmem:[#allocation11 + $0x20] sm:$0xff]  ;;  %v902_v40 = vld [vmem:[#allocation11 + $0x28] sm:$0xff] }
 0x121   : > { %vm810_vm1 = vcmp.eq.f32.partialorder %v809_v19, 0.0  ;;  %v1561_v41 = vpack.c.bf16 %v902_v40, %v901_v39  ;;  %v905_v45 = vld [vmem:[#allocation11 + $0x40] sm:$0xff]  ;;  %v906_v46 = vld [vmem:[#allocation11 + $0x48] sm:$0xff]  ;;  %v911_v54 = vld [vmem:[#allocation11 + $0x70] sm:$0xff] }
 0x122   : > { %1520 = vmatpush3.bf16.msra.mxu1 %v1519_v30  ;;  %v1567_v47 = vpack.c.bf16 %v906_v46, %v905_v45  ;;  %v909_v50 = vld [vmem:[#allocation11 + $0x60] sm:$0xff]  ;;  %v910_v51 = vld [vmem:[#allocation11 + $0x68] sm:$0xff]  ;;  %v912_v55 = vld [vmem:[#allocation11 + $0x78] sm:$0xff] }
 0x123   : > { %1496 = vmatpush3.bf16.msra.mxu0 %v1495_v31  ;;  %1521 = vmatprep.subr.bf16.mxu1 %v2064_v0  ;;  %v897_v31 = vld [vmem:[#allocation11] sm:$0xff] }
 0x124   : > { %1497 = vmatprep.subr.bf16.mxu0 %v2064_v0  ;;  %v1555_v34 = vpack.c.bf16 %v898_v32, %v897_v31 }
 0x126   : > { %1523 = vmatpush3.bf16.msra.mxu1 %v1522_v36  ;;  %v899_v36 = vld [vmem:[#allocation11 + $0x10] sm:$0xff] }
 0x127   : > { %1499 = vmatpush3.bf16.msra.mxu0 %v1498_v37  ;;  %1524 = vmatprep.subr.bf16.mxu1 %v2064_v0  ;;  %v900_v37 = vld [vmem:[#allocation11 + $0x18] sm:$0xff] }
 0x128   : > { %1500 = vmatprep.subr.bf16.mxu0 %v2064_v0  ;;  %v1558_v38 = vpack.c.bf16 %v900_v37, %v899_v36 }
 0x12a   : > { %1526 = vmatpush3.bf16.msra.mxu1 %v1525_v42  ;;  %v903_v42 = vld [vmem:[#allocation11 + $0x30] sm:$0xff] }
 0x12b   : > { %1502 = vmatpush3.bf16.msra.mxu0 %v1501_v43  ;;  %1527 = vmatprep.subr.bf16.mxu1 %v2064_v0  ;;  %v904_v43 = vld [vmem:[#allocation11 + $0x38] sm:$0xff] }
 0x12c   : > { %1503 = vmatprep.subr.bf16.mxu0 %v2064_v0  ;;  %v1564_v44 = vpack.c.bf16 %v904_v43, %v903_v42 }
 0x12e   : > { %1529 = vmatpush3.bf16.msra.mxu1 %v1528_v48  ;;  %v908_v48 = vld [vmem:[#allocation11 + $0x58] sm:$0xff] }
 0x12f   : > { %1505 = vmatpush3.bf16.msra.mxu0 %v1504_v49  ;;  %1442 = vmatprep.subr.mxu1 %v2066_v1 }
 0x130   : > { %1530 = vmatprep.subr.bf16.mxu0 %v2064_v0 }
 0x131   : > { %1400 = vmatmul.mubr.f32.vlgmr.msra.gmra.mrb[0].mxu1 %v2469_v52 }
 0x132   : > { %1365 = vmatmul.mubr.f32.vlgmr.msra.gmra.mrb[0].mxu0 %v2469_v52  ;;  %1444 = vmatprep.mubr.msk.f32.mxu1 %vm2065_vm0, %v2066_v1 }
 0x133   : > { %1532 = vmatpush3.bf16.msra.mxu0 %v1531_v53  ;;  %1434 = vmatprep.mubr.msk.f32.mxu0 %vm2065_vm0, %v2066_v1  ;;  %v1573_v53 = vpack.c.bf16 %v910_v51, %v909_v50 }
 0x134   : > { %1533 = vmatprep.subr.bf16.mxu0 %v2064_v0 }
 0x137   : > { %1535 = vmatpush3.bf16.msra.mxu0 %v1534_v56  ;;  %v1576_v56 = vpack.c.bf16 %v912_v55, %v911_v54 }
 0x138   : > { %1536 = vmatprep.subr.bf16.mxu0 %v2064_v0 }
 0x13b   : > { %1538 = vmatpush3.bf16.msra.mxu0 %v1537_v59 }
 0x13c   : > { %1539 = vmatprep.subr.bf16.mxu0 %v2064_v0 }
 0x13f   : > { %1541 = vmatpush3.bf16.msra.mxu0 %v1540_v62 }
 0x140   : > { %1542 = vmatprep.subr.bf16.mxu0 %v2064_v0 }
 0x143   : > { %1544 = vmatpush3.bf16.msra.mxu0 %v1543_v3 }
 0x144   : > { %1545 = vmatprep.subr.bf16.mxu0 %v2064_v0 }
 0x147   : > { %1547 = vmatpush3.bf16.msra.mxu0 %v1546_v6 }
 0x148   : > { %1548 = vmatprep.subr.bf16.mxu0 %v2064_v0 }
 0x14b   : > { %1550 = vmatpush3.bf16.msra.mxu0 %v1549_v9 }
 0x14c   : > { %1551 = vmatprep.subr.bf16.mxu0 %v2064_v0 }
 0x14f   : > { %1553 = vmatpush3.bf16.msra.mxu0 %v1552_v12 }
 0x150   : > { %1437 = vmatprep.subr.mxu0 %v2066_v1 }
 0x152   : > { %1435 = vmatmul.mubr.f32.vlgmr.msra.gmra.mrb[2].mxu0 %v2469_v52 }
 0x153   : > { %1439 = vmatprep.mubr.msk.f32.mxu0 %vm2065_vm0, %v2066_v1 }
 0x204   : > { %v648_v13 = vpop.f32.mrb[0].mxu1 }
 0x205   : > { %v1401_v14 = vpop.f32.mrb[1].mxu1  ;;  %1438 = vmatpush3.xpose.msra.mxu0 %v648_v13  ;;  %v562_v15 = vpop.f32.mrb[0].mxu0 }
 0x206   : > { %v1366_v16 = vpop.f32.mrb[1].mxu0 }
 0x208   : > { %1440 = vmatmul.mubr.f32.vlgmr.msra.gmra.mrb[4].mxu0 %v562_v15 }
 0x225   : > { %v734_v17 = vpop.f32.mrb[2].mxu0 }
 0x226   : > { %v1436_v18 = vpop.f32.mrb[3].mxu0  ;;  %1443 = vmatpush3.msra.mxu1 %v734_v17 }
 0x227   : > { %1554 = vmatprep.subr.bf16.mxu1 %v2064_v0 }
 0x2db   : > { %v804_v20 = vpop.f32.mrb[4].mxu0 }
 0x2dc   : > { %v808_v21 = vmul.f32 0.088388346, %v804_v20  ;;  %v1441_v22 = vpop.f32.mrb[5].mxu0 }
 0x2de   : > { %v811_v23 = vsel %vm810_vm1, -1e+09, %v808_v21 }
 0x2df   : > { %v813_v24 = vsel %vm812_vm2, %v811_v23, -inf }
 0x2e0   : > { %814 = vmax.xlane.f32.xlu0 %v813_v24 }
 0x36d   : > { %v815_v25 = vpop.xlane.xlu0 %814 }
 0x36e   : > { %v816_v26 = vsub.f32 %v811_v23, %v815_v25 }
 0x370   : > { %v817_v27 = vmul.f32 1.442695, %v816_v26 }
 0x372   : > { %1700 = vpow2.f32 %v817_v27 }
 0x37c   : > { %v1701_v28 = vpop.eup %1700 }
 0x37d   : > { %v819_v29 = vsel %vm812_vm2, %v1701_v28, 0.0 }
 0x37e   : > { %820 = vadd.xlane.f32.xlu0 %v819_v29 }
 0x40b   : > { %v821_v30 = vpop.xlane.xlu0 %820 }
 0x40c   : > { %1702 = vrcp.f32 %v821_v30 }
 0x416   : > { %v1703_v33 = vpop.eup %1702 }
 0x417   : > { %v823_v35 = vmul.f32 %v1703_v33, %v1701_v28 }
 0x419   : > { %1445 = vmatmul.mubr.msk.f32.vlgmr.msra.gmra.mrb[2].mxu1 %vm812_vm2, %v823_v35  ;;  %1012 = vst.msk [vmem:[%s478_s2] sm:$0xff] %vm812_vm2, %v823_v35 }
 0x41a   : > { %1556 = vmatpush3.bf16.msra.mxu1 %v1555_v34  ;;  %1479 = vmatprep.mubr.msk.f32.mxu1 %vm2065_vm0, %v2066_v1  ;;  %v907_v1 = vld [vmem:[#allocation11 + $0x50] sm:$0xff] }
 0x41b   : > { %1557 = vmatprep.subr.bf16.mxu1 %v2064_v0  ;;  %v1570_v49 = vpack.c.bf16 %v908_v48, %v907_v1 }
 0x41e   : > { %1559 = vmatpush3.bf16.msra.mxu1 %v1558_v38 }
 0x41f   : > { %1560 = vmatprep.subr.bf16.mxu1 %v2064_v0 }
 0x422   : > { %1562 = vmatpush3.bf16.msra.mxu1 %v1561_v41 }
 0x423   : > { %1563 = vmatprep.subr.bf16.mxu1 %v2064_v0 }
 0x426   : > { %1565 = vmatpush3.bf16.msra.mxu1 %v1564_v44 }
 0x427   : > { %1566 = vmatprep.subr.bf16.mxu1 %v2064_v0 }
 0x42a   : > { %1568 = vmatpush3.bf16.msra.mxu1 %v1567_v47 }
 0x42b   : > { %1569 = vmatprep.subr.bf16.mxu1 %v2064_v0 }
 0x42e   : > { %1571 = vmatpush3.bf16.msra.mxu1 %v1570_v49 }
 0x42f   : > { %1572 = vmatprep.subr.bf16.mxu1 %v2064_v0 }
 0x432   : > { %1574 = vmatpush3.bf16.msra.mxu1 %v1573_v53 }
 0x433   : > { %1575 = vmatprep.subr.bf16.mxu1 %v2064_v0 }
 0x436   : > { %1577 = vmatpush3.bf16.msra.mxu1 %v1576_v56 }
 0x4ec   : > { %v893_v57 = vpop.f32.mrb[2].mxu1 }
 0x4ed   : > { %v1446_v58 = vpop.f32.mrb[3].mxu1  ;;  %1480 = vmatmul.mubr.f32.vlgmr.msra.gmra.mrb[4].mxu1 %v893_v57 }
 0x5c0   : > { %v979_v59 = vpop.f32.mrb[4].mxu1 }
 0x5c1   : > { %v980_v60 = vadd.f32 %v979_v59, %v2469_v52  ;;  %v1481_v61 = vpop.f32.mrb[5].mxu1 }
 0x5c3   : > { %983 = vadd.xlane.f32.xlu1 %v980_v60 }
 0x650   : > { %v984_v62 = vpop.xlane.xlu1 %983 }
 0x651   : > { %v986_v63 = vmul.f32 0.0078125, %v984_v62 }
 0x653   : > { %v987_v2 = vsub.f32 %v980_v60, %v986_v63 }
 0x655   : > { %v988_v3 = vmul.f32 %v987_v2, %v987_v2 }
 0x657   : > { %989 = vadd.xlane.f32.xlu1 %v988_v3 }
 0x658   : > { %1947 = shalt.err (!%p1944_p8)
}
 0x659   : > { %s1948_s14 = scalar_lea.hbm %s2516_s29, 128  ;;  %s1952_s27 = scalar_lea.hbm %s2597_s9, 256 }
 0x65a   : > { %p1949_p9 = scmp.ne.s32.totalorder %s2516_s29, %s1948_s14  ;;  %p1953_p13 = scmp.lt.u32.totalorder %s2516_s29, %s2597_s9 }
 0x65b   : > { %p1954_p0 = scmp.lt.u32.totalorder %s1952_s27, %s1948_s14  ;;  %p1956_p4 = scmp.lt.u32.totalorder %s1948_s14, %s2516_s29 }
 0x65c   : > { %p1950_p12 = pnand %p1949_p9, %p2633_p10 }
 0x65d   : > { %p1955_p2 = por %p1954_p0, %p1953_p13 }
 0x65e   : > { %p1951_p1 = pneg %p1950_p12 }
 0x65f   : > { %p1957_p5 = por %p1956_p4, %p1955_p2 }
 0x661   : > { %p1958_p7 = pnand %p1957_p5, %p1951_p1 }
 0x663   : > { %1961 = shalt.err (!%p1958_p7)
}
 0x664   : > { %1607 = dma.vmem_to_hbm [thread:$0]  (%p2633_p10), %s1046_s23, 128, %s2516_s29, %s1019_s6   ;;  %v1252_v6 = vld [vmem:[#allocation13] ss:$0 sm:$0xff]  ;;  %v1253_v8 = vld [vmem:[#allocation14] ss:$0 sm:$0xff] }
 0x665   : > { %s471_s8 = scalar_lea.vmem [#allocation16], %s2417_s4  ;;  %s2634_s18 = sld [smem:[#allocation32_spill]] }
 0x666   : > { %s1032_s22 = sshll.u32 %s471_s8, 4  ;;  %s1014_s29 = scalar_lea.sflag [#allocation4], %s2414_s25  ;;  %s2546_s22 = int_to_ptr.vmem [resolvable:$true] %s1032_s22 }
 0x667   : > { %s1962_s23 = scalar_lea.vmem %s2546_s22, 128  ;;  %s2068_s4 = smov [#allocation16]  }
 0x668   : > { %p1963_p3 = scmp.ne.s32.totalorder %s2546_s22, %s1962_s23  ;;  %s1966_s6 = sshll.u32 %s2068_s4, 4  ;;  %s1967_s6 = int_to_ptr.vmem [resolvable:$false] %s1966_s6 }
 0x669   : > { %s1968_s15 = scalar_lea.vmem %s1967_s6, 256  ;;  %p1969_p8 = scmp.lt.s32.totalorder %s2546_s22, %s1967_s6 }
 0x66a   : > { %p1964_p6 = pnand %p1963_p3, %p2633_p10  ;;  %p1970_p9 = scmp.lt.s32.totalorder %s1968_s15, %s1962_s23 }
 0x66b   : > { %s2544_s17 = scalar_lea.hbm %s2634_s18, %s1256_s5 }
 0x66c   : > { %p1965_p11 = pneg %p1964_p6  ;;  %p1971_p12 = por %p1970_p9, %p1969_p8 }
 0x66e   : > { %p1972_p1 = pnand %p1971_p12, %p1965_p11 }
 0x6e4   : > { %v990_v0 = vpop.xlane.xlu1 %989 }
 0x6e5   : > { %v991_v52 = vmul.f32 0.0078125, %v990_v0 }
 0x6e7   : > { %v992_v4 = vadd.f32 1e-06, %v991_v52 }
 0x6e9   : > { %1704 = vrsqrt.f32 %v992_v4 }
 0x6f3   : > { %v1705_v5 = vpop.eup %1704 }
 0x6f4   : > { %v994_v7 = vmul.f32 %v1705_v5, %v987_v2 }
 0x6f6   : > { %v1002_v9 = vmul.f32 %v1252_v6, %v994_v7 }
 0x6f8   : > { %v1010_v10 = vadd.f32 %v1253_v8, %v1002_v9 }
 0x6fa   : > { %1011 = vst [vmem:[%s471_s8] sm:$0xff] %v1010_v10 }
 0x6fb   : > { %1975 = shalt.err (!%p1972_p1)
}
 0x6fc   : > { %s1976_s25 = scalar_lea.hbm %s2544_s17, 128  ;;  %s1980_s20 = scalar_lea.hbm %s2634_s18, 256 }
 0x6fd   : > { %p1977_p13 = scmp.ne.s32.totalorder %s2544_s17, %s1976_s25  ;;  %p1981_p4 = scmp.lt.u32.totalorder %s2544_s17, %s2634_s18 }
 0x6fe   : > { %p1982_p5 = scmp.lt.u32.totalorder %s1980_s20, %s1976_s25  ;;  %p1984_p3 = scmp.lt.u32.totalorder %s1976_s25, %s2544_s17 }
 0x6ff   : > { %p1978_p0 = pnand %p1977_p13, %p2633_p10 }
 0x700   : > { %p1983_p7 = por %p1982_p5, %p1981_p4 }
 0x701   : > { %p1979_p2 = pneg %p1978_p0 }
 0x702   : > { %p1985_p6 = por %p1984_p3, %p1983_p7 }
 0x704   : > { %p1986_p11 = pnand %p1985_p6, %p1979_p2 }
 0x706   : > { %1989 = shalt.err (!%p1986_p11)
}
 0x707   : > { %1606 = dma.vmem_to_hbm [thread:$0]  (%p2633_p10), %s2546_s22, 128, %s2544_s17, %s1014_s29  }
 0x708 PF: > { %s1057_s13 = sand.u32 1, %s2040_s30   ;;  %p2635_p8 = scmp.ne.s32.totalorder %s2621_s26, 0 }
 0x709   : > { %p2636_p9 = scmp.ge.s32.totalorder %s2052_s12, 2  ;;  %s1058_s2 = scalar_lea.sflag [#allocation4], %s1057_s13 }
 0x70b   : > { %p1637_p12 = pnand %p2636_p9, %p2635_p8 }
 0x70d   : > { %2031 = dma.done.wait (!%p1637_p12), %s1058_s2, 128  }
 0x70e   : > { %2033 = vsyncadd (!%p1637_p12), %s1058_s2, 4294967168  ;;  %s1067_s8 = scalar_lea.sflag [#allocation18], %s1057_s13 }
 0x70f   : > { %2035 = dma.done.wait (!%p1637_p12), %s1067_s8, 128  }
 0x710   : > { %2037 = vsyncadd (!%p1637_p12), %s1067_s8, 4294967168  ;;  %p32_p10 = scmp.ge.s32.totalorder %s2307_s19, 4   ;;  %s2637_s30 = smov %s2044_s10 }
 0x711   : > { %s2638_s10 = smov %s2048_s11  ;;  %s2639_s11 = smov %s2318_s21 }
 0x712   : > { %s2640_s12 = smov %s2307_s19  ;;  %34 = sbr.rel (!%p32_p10) target bundleno = 19 (0x13), region = 151 }
 0x719   :  { %1072 = vsyncpa [#allocation3], 1 }
 0x71a   :  { %1074 = vsyncpa [#allocation3 + $0x1], 1 }
 0x71b   :  { %1075 = vsyncpa [#allocation6], 1 }
 0x71c   :  { %1077 = vsyncpa [#allocation6 + $0x1], 1 }
 0x71d   :  { %1078 = vsyncpa [#allocation9], 1 }
 0x71e   :  { %1079 = vsyncpa [#allocation12], 1 }
 0x71f   :  { %1080 = vsyncpa [#allocation15], 1 }
 0x720   :  { %1081 = vsyncpa [#allocation4], 1 }
 0x721   :  { %1083 = vsyncpa [#allocation4 + $0x1], 1 }
 0x722   :  { %1084 = vsyncpa [#allocation18], 1 }
 0x723   :  { %1086 = vsyncpa [#allocation18 + $0x1], 1 }

// kernel: bert4rec_block.3
= control target key start
LH: loop header
LB: loop body
LE: loop exit
PB: predicated region body
PF: predicated region fallthrough
CT: control target
= control target key end

     0   :  { %12 = vsyncpa [#allocation4], 0  ;;  %s1299_s0 = inlined_call_operand.hbm [shape: f32[16,128], index: 0, kind: input, shape index: {}]   ;;  %s1300_s1 = inlined_call_operand.hbm [shape: f32[128,512], index: 1, kind: input, shape index: {}]   ;;  %s1301_s2 = inlined_call_operand.hbm [shape: f32[1,512], index: 2, kind: input, shape index: {}]   ;;  %s1302_s3 = inlined_call_operand.hbm [shape: f32[512,128], index: 3, kind: input, shape index: {}]   ;;  %s1303_s4 = inlined_call_operand.hbm [shape: f32[1,128], index: 4, kind: input, shape index: {}]   ;;  %s1304_s5 = inlined_call_operand.hbm [shape: f32[1,128], index: 5, kind: input, shape index: {}]   ;;  %s1305_s6 = inlined_call_operand.hbm [shape: f32[1,128], index: 6, kind: input, shape index: {}]   ;;  %s1306_s7 = inlined_call_operand.hbm [shape: f32[16,128], index: 7, kind: output, shape index: {}]  }
   0x1   :  { %13 = vsyncpa [#allocation7], 0 }
   0x2   :  { %14 = vsyncpa [#allocation10], 0 }
   0x3   :  { %15 = vsyncpa [#allocation13], 0 }
   0x4   :  { %16 = vsyncpa [#allocation5], 0  ;;  %s1127_s24 = smov [#allocation6]   ;;  %s941_s28 = scalar_lea.hbm %s1300_s1, 8192 }
   0x5   :  { %s34_s25 = sshll.u32 %s1127_s24, 4  ;;  %p942_p0 = scmp.ne.s32.totalorder %s1300_s1, %s941_s28  ;;  %s35_s25 = int_to_ptr.vmem [resolvable:$true] %s34_s25 }
   0x6   :  { %p945_p1 = scmp.lt.u32.totalorder %s941_s28, %s1300_s1 }
   0x8   :  { %p947_p2 = pnand %p945_p1, %p942_p0 }
   0xa   :  { %950 = shalt.err (!%p947_p2)
}
   0xb   :  { %s951_s10 = scalar_lea.vmem %s35_s25, 8192  ;;  %p956_p4 = scmp.lt.s32.totalorder %s35_s25, %s35_s25 }
   0xc   :  { %p952_p3 = scmp.ne.s32.totalorder %s35_s25, %s951_s10  ;;  %p957_p5 = scmp.lt.s32.totalorder %s951_s10, %s951_s10 }
   0xe   :  { %p958_p6 = por %p957_p5, %p956_p4 }
  0x10   :  { %p959_p7 = pnand %p958_p6, %p952_p3 }
  0x12   :  { %962 = shalt.err (!%p959_p7)
}
  0x13   :  { %s1128_s11 = smov 512   ;;  %s1129_s12 = smov 32  }
  0x14   :  { %40 = dma.hbm_to_vmem [thread:$0]  %s1300_s1, 8192, %s35_s25, [#allocation7], %s1128_s11, %s1128_s11, %s1129_s12  }
  0x15   :  { %s1130_s15 = smov [#allocation9]   ;;  %s1131_s17 = smov [#allocation12]  }
  0x16   :  { %s56_s16 = sshll.u32 %s1130_s15, 4  ;;  %s79_s18 = sshll.u32 %s1131_s17, 4  ;;  %s57_s16 = int_to_ptr.vmem [resolvable:$true] %s56_s16  ;;  %s80_s18 = int_to_ptr.vmem [resolvable:$true] %s79_s18 }
  0x17   :  { %s963_s21 = scalar_lea.hbm %s1302_s3, 8192 }
  0x18   :  { %p964_p8 = scmp.ne.s32.totalorder %s1302_s3, %s963_s21  ;;  %p967_p9 = scmp.lt.u32.totalorder %s963_s21, %s1302_s3 }
  0x1a   :  { %p969_p10 = pnand %p967_p9, %p964_p8 }
  0x1c   :  { %972 = shalt.err (!%p969_p10)
}
  0x1d   :  { %s973_s1 = scalar_lea.vmem %s57_s16, 8192  ;;  %p978_p12 = scmp.lt.s32.totalorder %s57_s16, %s57_s16 }
  0x1e   :  { %p974_p11 = scmp.ne.s32.totalorder %s57_s16, %s973_s1  ;;  %p979_p13 = scmp.lt.s32.totalorder %s973_s1, %s973_s1 }
  0x20   :  { %p980_p0 = por %p979_p13, %p978_p12 }
  0x22   :  { %p981_p1 = pnand %p980_p0, %p974_p11 }
  0x24   :  { %984 = shalt.err (!%p981_p1)
}
  0x25   :  { %s1132_s25 = smov 128   ;;  %s1133_s27 = smov 8  }
  0x26   :  { %62 = dma.hbm_to_vmem [thread:$0]  %s1302_s3, 8192, %s57_s16, [#allocation10], %s1132_s25, %s1132_s25, %s1133_s27  }
  0x27   :  { %s985_s9 = scalar_lea.hbm %s1304_s5, 16 }
  0x28   :  { %p986_p2 = scmp.ne.s32.totalorder %s1304_s5, %s985_s9  ;;  %p989_p3 = scmp.lt.u32.totalorder %s985_s9, %s1304_s5 }
  0x2a   :  { %p991_p4 = pnand %p989_p3, %p986_p2 }
  0x2c   :  { %994 = shalt.err (!%p991_p4)
}
  0x2d   :  { %s995_s14 = scalar_lea.vmem %s80_s18, 16  ;;  %s999_s15 = scalar_lea.vmem %s80_s18, 32 }
  0x2e   :  { %p996_p5 = scmp.ne.s32.totalorder %s80_s18, %s995_s14  ;;  %p1000_p6 = scmp.lt.s32.totalorder %s80_s18, %s80_s18 }
  0x2f   :  { %p1001_p7 = scmp.lt.s32.totalorder %s999_s15, %s995_s14 }
  0x31   :  { %p1002_p8 = por %p1001_p7, %p1000_p6 }
  0x33   :  { %p1003_p9 = pnand %p1002_p8, %p996_p5 }
  0x35   :  { %1006 = shalt.err (!%p1003_p9)
}
  0x36   :  { %82 = dma.hbm_to_vmem [thread:$0]  %s1304_s5, 16, %s80_s18, [#allocation13]  }
  0x37   :  { %s1134_s17 = smov [#allocation3]   ;;  %s1135_s20 = smov [#allocation8]  }
  0x38   :  { %s22_s19 = sshll.u32 %s1134_s17, 4  ;;  %s47_s21 = sshll.u32 %s1135_s20, 4  ;;  %s23_s19 = int_to_ptr.vmem [resolvable:$true] %s22_s19  ;;  %s48_s21 = int_to_ptr.vmem [resolvable:$true] %s47_s21 }
  0x39   :  { %s1007_s24 = scalar_lea.hbm %s1299_s0, 256 }
  0x3a   :  { %p1008_p10 = scmp.ne.s32.totalorder %s1299_s0, %s1007_s24  ;;  %p1011_p11 = scmp.lt.u32.totalorder %s1007_s24, %s1299_s0 }
  0x3c   :  { %p1013_p12 = pnand %p1011_p11, %p1008_p10 }
  0x3e   :  { %1016 = shalt.err (!%p1013_p12)
}
  0x3f   :  { %s1017_s5 = scalar_lea.vmem %s23_s19, 256  ;;  %p1022_p0 = scmp.lt.s32.totalorder %s23_s19, %s23_s19 }
  0x40   :  { %p1018_p13 = scmp.ne.s32.totalorder %s23_s19, %s1017_s5  ;;  %p1023_p1 = scmp.lt.s32.totalorder %s1017_s5, %s1017_s5 }
  0x42   :  { %p1024_p2 = por %p1023_p1, %p1022_p0 }
  0x44   :  { %p1025_p3 = pnand %p1024_p2, %p1018_p13 }
  0x46   :  { %1028 = shalt.err (!%p1025_p3)
}
  0x47   :  { %28 = dma.hbm_to_vmem [thread:$0]  %s1299_s0, 256, %s23_s19, [#allocation4], %s1132_s25, %s1132_s25, %s1133_s27  }
  0x48   :  { %s1029_s10 = scalar_lea.hbm %s1301_s2, 64 }
  0x49   :  { %p1030_p4 = scmp.ne.s32.totalorder %s1301_s2, %s1029_s10  ;;  %p1033_p5 = scmp.lt.u32.totalorder %s1029_s10, %s1301_s2 }
  0x4b   :  { %p1035_p6 = pnand %p1033_p5, %p1030_p4 }
  0x4d   :  { %1038 = shalt.err (!%p1035_p6)
}
  0x4e   :  { %s1039_s15 = scalar_lea.vmem %s48_s21, 64  ;;  %p1044_p8 = scmp.lt.s32.totalorder %s48_s21, %s48_s21 }
  0x4f   :  { %p1040_p7 = scmp.ne.s32.totalorder %s48_s21, %s1039_s15  ;;  %p1045_p9 = scmp.lt.s32.totalorder %s1039_s15, %s1039_s15 }
  0x51   :  { %p1046_p10 = por %p1045_p9, %p1044_p8 }
  0x53   :  { %p1047_p11 = pnand %p1046_p10, %p1040_p7 }
  0x55   :  { %1050 = shalt.err (!%p1047_p11)
}
  0x56   :  { %50 = dma.hbm_to_vmem [thread:$0]  %s1301_s2, 64, %s48_s21, [#allocation7]  }
  0x57   :  { %s1136_s16 = smov [#allocation11]   ;;  %s1137_s19 = smov [#allocation14]  }
  0x58   :  { %s69_s17 = sshll.u32 %s1136_s16, 4  ;;  %s89_s20 = sshll.u32 %s1137_s19, 4  ;;  %s70_s17 = int_to_ptr.vmem [resolvable:$true] %s69_s17  ;;  %s90_s20 = int_to_ptr.vmem [resolvable:$true] %s89_s20 }
  0x59   :  { %s1051_s24 = scalar_lea.hbm %s1303_s4, 16 }
  0x5a   :  { %p1052_p12 = scmp.ne.s32.totalorder %s1303_s4, %s1051_s24  ;;  %p1055_p13 = scmp.lt.u32.totalorder %s1051_s24, %s1303_s4 }
  0x5c   :  { %p1057_p0 = pnand %p1055_p13, %p1052_p12 }
  0x5e   :  { %1060 = shalt.err (!%p1057_p0)
}
  0x5f   :  { %s1061_s2 = scalar_lea.vmem %s70_s17, 16  ;;  %s1065_s21 = scalar_lea.vmem %s70_s17, 32 }
  0x60   :  { %p1062_p1 = scmp.ne.s32.totalorder %s70_s17, %s1061_s2  ;;  %p1066_p2 = scmp.lt.s32.totalorder %s70_s17, %s70_s17 }
  0x61   :  { %p1067_p3 = scmp.lt.s32.totalorder %s1065_s21, %s1061_s2 }
  0x63   :  { %p1068_p4 = por %p1067_p3, %p1066_p2 }
  0x65   :  { %p1069_p5 = pnand %p1068_p4, %p1062_p1 }
  0x67   :  { %1072 = shalt.err (!%p1069_p5)
}
  0x68   :  { %72 = dma.hbm_to_vmem [thread:$0]  %s1303_s4, 16, %s70_s17, [#allocation10]  }
  0x69   :  { %s1073_s9 = scalar_lea.hbm %s1305_s6, 16 }
  0x6a   :  { %p1074_p6 = scmp.ne.s32.totalorder %s1305_s6, %s1073_s9  ;;  %p1077_p7 = scmp.lt.u32.totalorder %s1073_s9, %s1305_s6 }
  0x6c   :  { %p1079_p8 = pnand %p1077_p7, %p1074_p6 }
  0x6e   :  { %1082 = shalt.err (!%p1079_p8)
}
  0x6f   :  { %s1083_s14 = scalar_lea.vmem %s90_s20, 16  ;;  %s1087_s15 = scalar_lea.vmem %s90_s20, 32 }
  0x70   :  { %p1084_p9 = scmp.ne.s32.totalorder %s90_s20, %s1083_s14  ;;  %p1088_p10 = scmp.lt.s32.totalorder %s90_s20, %s90_s20 }
  0x71   :  { %p1089_p11 = scmp.lt.s32.totalorder %s1087_s15, %s1083_s14 }
  0x73   :  { %p1090_p12 = por %p1089_p11, %p1088_p10 }
  0x75   :  { %p1091_p13 = pnand %p1090_p12, %p1084_p9 }
  0x77   :  { %1094 = shalt.err (!%p1091_p13)
}
  0x78   :  { %92 = dma.hbm_to_vmem [thread:$0]  %s1305_s6, 16, %s90_s20, [#allocation13]  }
  0x79   :  { %1117 = dma.done.wait [#allocation4], 256  }
  0x7a   :  { %1118 = vsyncadd [#allocation4], 4294967040 }
  0x7b   :  { %1119 = dma.done.wait [#allocation7], 8256  }
  0x7c   :  { %1120 = vsyncadd [#allocation7], 4294959040 }
  0x7d   :  { %1121 = dma.done.wait [#allocation10], 8208  }
  0x7e   :  { %1122 = vsyncadd [#allocation10], 4294959088 }
  0x7f   :  { %1123 = dma.done.wait [#allocation13], 32  }
  0x80   :  { %1124 = vsyncadd [#allocation13], 4294967264  ;;  %v1138_v0 = vmov 0.0   ;;  %v130_v1 = vld [vmem:[#allocation6 + $0x8] sm:$0xff]  ;;  %v132_v3 = vld [vmem:[#allocation6 + $0x18] sm:$0xff]  ;;  %s1139_s6 = smov [#allocation15]  }
  0x81   :  { %279 = vmatprep.mubr.f32.mxu0 %v1138_v0  ;;  %356 = vmatprep.mubr.f32.mxu1 %v1138_v0  ;;  %v134_v2 = vld [vmem:[#allocation6 + $0x28] sm:$0xff]  ;;  %v136_v5 = vld [vmem:[#allocation6 + $0x38] sm:$0xff]  ;;  %v129_v6 = vld [vmem:[#allocation6] sm:$0xff]  ;;  %s686_s3 = sshll.u32 %s1139_s6, 4  ;;  %s687_s3 = int_to_ptr.vmem [resolvable:$true] %s686_s3 }
  0x82   :  { %v780_v4 = vpack.c.bf16 %v134_v2, %v130_v1  ;;  %v133_v7 = vld [vmem:[#allocation6 + $0x20] sm:$0xff]  ;;  %v812_v8 = vpack.c.bf16 %v136_v5, %v132_v3  ;;  %v131_v10 = vld [vmem:[#allocation6 + $0x10] sm:$0xff]  ;;  %v138_v12 = vld [vmem:[#allocation6 + $0x48] sm:$0xff]  ;;  %s1095_s16 = scalar_lea.vmem %s687_s3, 256  ;;  %p1100_p1 = scmp.lt.s32.totalorder %s687_s3, %s687_s3 }
  0x83   :  { %v782_v9 = vpack.c.bf16 %v133_v7, %v129_v6  ;;  %v135_v11 = vld [vmem:[#allocation6 + $0x30] sm:$0xff]  ;;  %v142_v14 = vld [vmem:[#allocation6 + $0x68] sm:$0xff]  ;;  %v140_v15 = vld [vmem:[#allocation6 + $0x58] sm:$0xff]  ;;  %p1096_p0 = scmp.ne.s32.totalorder %s687_s3, %s1095_s16  ;;  %p1101_p2 = scmp.lt.s32.totalorder %s1095_s16, %s1095_s16 }
  0x84   :  { %781 = vmatprep.subr.bf16.mxu0 %v780_v4  ;;  %v814_v13 = vpack.c.bf16 %v135_v11, %v131_v10  ;;  %v144_v16 = vld [vmem:[#allocation6 + $0x78] sm:$0xff]  ;;  %813 = vmatprep.subr.bf16.mxu1 %v812_v8  ;;  %v784_v17 = vpack.c.bf16 %v142_v14, %v138_v12  ;;  %v137_v19 = vld [vmem:[#allocation6 + $0x40] sm:$0xff]  ;;  %v139_v21 = vld [vmem:[#allocation6 + $0x50] sm:$0xff] }
  0x85   :  { %783 = vmatpush1.bf16.msra.mxu0 %v782_v9  ;;  %v816_v18 = vpack.c.bf16 %v144_v16, %v140_v15  ;;  %v141_v20 = vld [vmem:[#allocation6 + $0x60] sm:$0xff]  ;;  %v143_v23 = vld [vmem:[#allocation6 + $0x70] sm:$0xff]  ;;  %v146_v24 = vld [vmem:[#allocation6 + $0x88] sm:$0xff]  ;;  %p1102_p3 = por %p1101_p2, %p1100_p1 }
  0x86   :  { %815 = vmatpush1.bf16.msra.mxu1 %v814_v13  ;;  %v786_v22 = vpack.c.bf16 %v141_v20, %v137_v19  ;;  %v150_v25 = vld [vmem:[#allocation6 + $0xa8] sm:$0xff]  ;;  %785 = vmatprep.subr.bf16.mxu0 %v784_v17  ;;  %v818_v26 = vpack.c.bf16 %v143_v23, %v139_v21  ;;  %v148_v28 = vld [vmem:[#allocation6 + $0x98] sm:$0xff]  ;;  %v145_v30 = vld [vmem:[#allocation6 + $0x80] sm:$0xff] }
  0x87   :  { %817 = vmatprep.subr.bf16.mxu1 %v816_v18  ;;  %v788_v27 = vpack.c.bf16 %v150_v25, %v146_v24  ;;  %v152_v29 = vld [vmem:[#allocation6 + $0xb8] sm:$0xff]  ;;  %v149_v32 = vld [vmem:[#allocation6 + $0xa0] sm:$0xff]  ;;  %v147_v33 = vld [vmem:[#allocation6 + $0x90] sm:$0xff]  ;;  %p1103_p4 = pnand %p1102_p3, %p1096_p0 }
  0x88   :  { %v820_v31 = vpack.c.bf16 %v152_v29, %v148_v28  ;;  %v151_v34 = vld [vmem:[#allocation6 + $0xb0] sm:$0xff]  ;;  %v790_v35 = vpack.c.bf16 %v149_v32, %v145_v30  ;;  %v154_v36 = vld [vmem:[#allocation6 + $0xc8] sm:$0xff]  ;;  %v156_v38 = vld [vmem:[#allocation6 + $0xd8] sm:$0xff] }
  0x89   :  { %787 = vmatpush1.bf16.msra.mxu0 %v786_v22  ;;  %v158_v37 = vld [vmem:[#allocation6 + $0xe8] sm:$0xff]  ;;  %v822_v39 = vpack.c.bf16 %v151_v34, %v147_v33  ;;  %v160_v41 = vld [vmem:[#allocation6 + $0xf8] sm:$0xff]  ;;  %v153_v42 = vld [vmem:[#allocation6 + $0xc0] sm:$0xff] }
  0x8a   :  { %819 = vmatpush1.bf16.msra.mxu1 %v818_v26  ;;  %789 = vmatprep.subr.bf16.mxu0 %v788_v27  ;;  %v792_v40 = vpack.c.bf16 %v158_v37, %v154_v36  ;;  %v157_v43 = vld [vmem:[#allocation6 + $0xe0] sm:$0xff]  ;;  %v824_v44 = vpack.c.bf16 %v160_v41, %v156_v38  ;;  %v155_v45 = vld [vmem:[#allocation6 + $0xd0] sm:$0xff]  ;;  %v162_v47 = vld [vmem:[#allocation6 + $0x108] sm:$0xff] }
  0x8b   :  { %821 = vmatprep.subr.bf16.mxu1 %v820_v31  ;;  %v159_v46 = vld [vmem:[#allocation6 + $0xf0] sm:$0xff]  ;;  %v166_v48 = vld [vmem:[#allocation6 + $0x128] sm:$0xff]  ;;  %v164_v49 = vld [vmem:[#allocation6 + $0x118] sm:$0xff]  ;;  %v794_v51 = vpack.c.bf16 %v157_v43, %v153_v42 }
  0x8c   :  { %v168_v50 = vld [vmem:[#allocation6 + $0x138] sm:$0xff]  ;;  %v826_v52 = vpack.c.bf16 %v159_v46, %v155_v45  ;;  %v796_v53 = vpack.c.bf16 %v166_v48, %v162_v47  ;;  %v161_v54 = vld [vmem:[#allocation6 + $0x100] sm:$0xff]  ;;  %v163_v56 = vld [vmem:[#allocation6 + $0x110] sm:$0xff] }
  0x8d   :  { %791 = vmatpush1.bf16.msra.mxu0 %v790_v35  ;;  %v165_v55 = vld [vmem:[#allocation6 + $0x120] sm:$0xff]  ;;  %v828_v57 = vpack.c.bf16 %v168_v50, %v164_v49  ;;  %v167_v58 = vld [vmem:[#allocation6 + $0x130] sm:$0xff]  ;;  %v170_v59 = vld [vmem:[#allocation6 + $0x148] sm:$0xff] }
  0x8e   :  { %823 = vmatpush1.bf16.msra.mxu1 %v822_v39  ;;  %793 = vmatprep.subr.bf16.mxu0 %v792_v40  ;;  %v174_v60 = vld [vmem:[#allocation6 + $0x168] sm:$0xff]  ;;  %v172_v61 = vld [vmem:[#allocation6 + $0x158] sm:$0xff]  ;;  %v798_v63 = vpack.c.bf16 %v165_v55, %v161_v54  ;;  %v830_v1 = vpack.c.bf16 %v167_v58, %v163_v56  ;;  %v169_v3 = vld [vmem:[#allocation6 + $0x140] sm:$0xff] }
  0x8f   :  { %825 = vmatprep.subr.bf16.mxu1 %v824_v44  ;;  %v176_v62 = vld [vmem:[#allocation6 + $0x178] sm:$0xff]  ;;  %v800_v2 = vpack.c.bf16 %v174_v60, %v170_v59  ;;  %v173_v4 = vld [vmem:[#allocation6 + $0x160] sm:$0xff]  ;;  %v171_v5 = vld [vmem:[#allocation6 + $0x150] sm:$0xff] }
  0x90   :  { %v832_v6 = vpack.c.bf16 %v176_v62, %v172_v61  ;;  %v175_v7 = vld [vmem:[#allocation6 + $0x170] sm:$0xff]  ;;  %v178_v8 = vld [vmem:[#allocation6 + $0x188] sm:$0xff]  ;;  %v180_v10 = vld [vmem:[#allocation6 + $0x198] sm:$0xff]  ;;  %v802_v12 = vpack.c.bf16 %v173_v4, %v169_v3 }
  0x91   :  { %795 = vmatpush1.bf16.msra.mxu0 %v794_v51  ;;  %v182_v9 = vld [vmem:[#allocation6 + $0x1a8] sm:$0xff]  ;;  %v184_v11 = vld [vmem:[#allocation6 + $0x1b8] sm:$0xff]  ;;  %v834_v13 = vpack.c.bf16 %v175_v7, %v171_v5  ;;  %v177_v15 = vld [vmem:[#allocation6 + $0x180] sm:$0xff] }
  0x92   :  { %827 = vmatpush1.bf16.msra.mxu1 %v826_v52  ;;  %797 = vmatprep.subr.bf16.mxu0 %v796_v53  ;;  %v804_v14 = vpack.c.bf16 %v182_v9, %v178_v8  ;;  %v181_v16 = vld [vmem:[#allocation6 + $0x1a0] sm:$0xff]  ;;  %v179_v17 = vld [vmem:[#allocation6 + $0x190] sm:$0xff]  ;;  %v836_v18 = vpack.c.bf16 %v184_v11, %v180_v10  ;;  %v186_v20 = vld [vmem:[#allocation6 + $0x1c8] sm:$0xff] }
  0x93   :  { %829 = vmatprep.subr.bf16.mxu1 %v828_v57  ;;  %v183_v19 = vld [vmem:[#allocation6 + $0x1b0] sm:$0xff]  ;;  %v190_v21 = vld [vmem:[#allocation6 + $0x1e8] sm:$0xff]  ;;  %v188_v22 = vld [vmem:[#allocation6 + $0x1d8] sm:$0xff]  ;;  %v806_v24 = vpack.c.bf16 %v181_v16, %v177_v15 }
  0x94   :  { %v192_v23 = vld [vmem:[#allocation6 + $0x1f8] sm:$0xff]  ;;  %v838_v25 = vpack.c.bf16 %v183_v19, %v179_v17  ;;  %v808_v26 = vpack.c.bf16 %v190_v21, %v186_v20  ;;  %v185_v27 = vld [vmem:[#allocation6 + $0x1c0] sm:$0xff]  ;;  %v187_v29 = vld [vmem:[#allocation6 + $0x1d0] sm:$0xff] }
  0x95   :  { %799 = vmatpush1.bf16.msra.mxu0 %v798_v63  ;;  %v189_v28 = vld [vmem:[#allocation6 + $0x1e0] sm:$0xff]  ;;  %v840_v30 = vpack.c.bf16 %v192_v23, %v188_v22  ;;  %v191_v31 = vld [vmem:[#allocation6 + $0x1f0] sm:$0xff]  ;;  %v1277_v59 = vld [vmem:[#allocation3 + $0x8] sm:$0xff] }
  0x96   :  { %831 = vmatpush1.bf16.msra.mxu1 %v830_v1  ;;  %801 = vmatprep.subr.bf16.mxu0 %v800_v2  ;;  %v427_v32 = vld [vmem:[#allocation9 + $0x80] sm:$0xff]  ;;  %v428_v33 = vld [vmem:[#allocation9 + $0x88] sm:$0xff]  ;;  %v810_v36 = vpack.c.bf16 %v189_v28, %v185_v27  ;;  %v842_v37 = vpack.c.bf16 %v191_v31, %v187_v29  ;;  %v429_v44 = vld [vmem:[#allocation9 + $0x90] sm:$0xff] }
  0x97   :  { %833 = vmatprep.subr.bf16.mxu1 %v832_v6  ;;  %v459_v34 = vld [vmem:[#allocation9 + $0x180] sm:$0xff]  ;;  %v460_v35 = vld [vmem:[#allocation9 + $0x188] sm:$0xff]  ;;  %v844_v38 = vpack.c.bf16 %v428_v33, %v427_v32  ;;  %v430_v45 = vld [vmem:[#allocation9 + $0x98] sm:$0xff] }
  0x98   :  { %v876_v39 = vpack.c.bf16 %v460_v35, %v459_v34  ;;  %v411_v40 = vld [vmem:[#allocation9] sm:$0xff]  ;;  %v412_v41 = vld [vmem:[#allocation9 + $0x8] sm:$0xff]  ;;  %v461_v47 = vld [vmem:[#allocation9 + $0x190] sm:$0xff]  ;;  %v848_v51 = vpack.c.bf16 %v430_v45, %v429_v44 }
  0x99   :  { %803 = vmatpush1.bf16.msra.mxu0 %v802_v12  ;;  %v443_v42 = vld [vmem:[#allocation9 + $0x100] sm:$0xff]  ;;  %v444_v43 = vld [vmem:[#allocation9 + $0x108] sm:$0xff]  ;;  %v462_v48 = vld [vmem:[#allocation9 + $0x198] sm:$0xff]  ;;  %v846_v49 = vpack.c.bf16 %v412_v41, %v411_v40 }
  0x9a   :  { %835 = vmatpush1.bf16.msra.mxu1 %v834_v13  ;;  %805 = vmatprep.subr.bf16.mxu0 %v804_v14  ;;  %v1272_v46 = vld [vmem:[#allocation3] sm:$0xff]  ;;  %v878_v50 = vpack.c.bf16 %v444_v43, %v443_v42  ;;  %v414_v53 = vld [vmem:[#allocation9 + $0x18] sm:$0xff]  ;;  %v880_v55 = vpack.c.bf16 %v462_v48, %v461_v47  ;;  %v431_v57 = vld [vmem:[#allocation9 + $0xa0] sm:$0xff] }
  0x9b   :  { %837 = vmatprep.subr.bf16.mxu1 %v836_v18  ;;  %v413_v52 = vld [vmem:[#allocation9 + $0x10] sm:$0xff]  ;;  %v446_v56 = vld [vmem:[#allocation9 + $0x118] sm:$0xff]  ;;  %v432_v58 = vld [vmem:[#allocation9 + $0xa8] sm:$0xff] }
  0x9c   :  { %v445_v54 = vld [vmem:[#allocation9 + $0x110] sm:$0xff]  ;;  %v463_v60 = vld [vmem:[#allocation9 + $0x1a0] sm:$0xff]  ;;  %v464_v61 = vld [vmem:[#allocation9 + $0x1a8] sm:$0xff]  ;;  %v850_v62 = vpack.c.bf16 %v414_v53, %v413_v52  ;;  %v852_v1 = vpack.c.bf16 %v432_v58, %v431_v57 }
  0x9d   :  { %807 = vmatpush1.bf16.msra.mxu0 %v806_v24  ;;  %v882_v63 = vpack.c.bf16 %v446_v56, %v445_v54  ;;  %v415_v2 = vld [vmem:[#allocation9 + $0x20] sm:$0xff]  ;;  %v416_v3 = vld [vmem:[#allocation9 + $0x28] sm:$0xff]  ;;  %v884_v4 = vpack.c.bf16 %v464_v61, %v463_v60  ;;  %v433_v8 = vld [vmem:[#allocation9 + $0xb0] sm:$0xff] }
  0x9e   :  { %839 = vmatpush1.bf16.msra.mxu1 %v838_v25  ;;  %809 = vmatprep.subr.bf16.mxu0 %v808_v26  ;;  %v447_v5 = vld [vmem:[#allocation9 + $0x120] sm:$0xff]  ;;  %v448_v6 = vld [vmem:[#allocation9 + $0x128] sm:$0xff]  ;;  %v854_v7 = vpack.c.bf16 %v416_v3, %v415_v2  ;;  %v434_v9 = vld [vmem:[#allocation9 + $0xb8] sm:$0xff] }
  0x9f   :  { %841 = vmatprep.subr.bf16.mxu1 %v840_v30  ;;  %v465_v10 = vld [vmem:[#allocation9 + $0x1b0] sm:$0xff]  ;;  %v856_v11 = vpack.c.bf16 %v434_v9, %v433_v8  ;;  %v466_v12 = vld [vmem:[#allocation9 + $0x1b8] sm:$0xff]  ;;  %v435_v20 = vld [vmem:[#allocation9 + $0xc0] sm:$0xff] }
  0xa0   :  { %v417_v13 = vld [vmem:[#allocation9 + $0x30] sm:$0xff]  ;;  %v418_v14 = vld [vmem:[#allocation9 + $0x38] sm:$0xff]  ;;  %v888_v15 = vpack.c.bf16 %v466_v12, %v465_v10  ;;  %v436_v21 = vld [vmem:[#allocation9 + $0xc8] sm:$0xff] }
  0xa1   :  { %811 = vmatpush1.bf16.msra.mxu0 %v810_v36  ;;  %v858_v16 = vpack.c.bf16 %v418_v14, %v417_v13  ;;  %v449_v17 = vld [vmem:[#allocation9 + $0x130] sm:$0xff]  ;;  %v450_v18 = vld [vmem:[#allocation9 + $0x138] sm:$0xff]  ;;  %v467_v22 = vld [vmem:[#allocation9 + $0x1c0] sm:$0xff]  ;;  %v860_v23 = vpack.c.bf16 %v436_v21, %v435_v20 }
  0xa2   :  { %843 = vmatpush1.bf16.msra.mxu1 %v842_v37  ;;  %845 = vmatprep.subr.bf16.mxu0 %v844_v38  ;;  %v890_v19 = vpack.c.bf16 %v450_v18, %v449_v17  ;;  %v468_v24 = vld [vmem:[#allocation9 + $0x1c8] sm:$0xff]  ;;  %v419_v25 = vld [vmem:[#allocation9 + $0x40] sm:$0xff]  ;;  %v437_v32 = vld [vmem:[#allocation9 + $0xd0] sm:$0xff] }
  0xa3   :  { %877 = vmatprep.subr.bf16.mxu1 %v876_v39  ;;  %v420_v26 = vld [vmem:[#allocation9 + $0x48] sm:$0xff]  ;;  %v892_v27 = vpack.c.bf16 %v468_v24, %v467_v22  ;;  %v451_v29 = vld [vmem:[#allocation9 + $0x140] sm:$0xff]  ;;  %v438_v33 = vld [vmem:[#allocation9 + $0xd8] sm:$0xff] }
  0xa4   :  { %280 = vmatmul.mubr.f32.vlgmr.msra.gmra.mrb[0].mxu0 %v1272_v46  ;;  %v862_v28 = vpack.c.bf16 %v420_v26, %v419_v25  ;;  %v452_v30 = vld [vmem:[#allocation9 + $0x148] sm:$0xff]  ;;  %v469_v34 = vld [vmem:[#allocation9 + $0x1d0] sm:$0xff]  ;;  %v864_v35 = vpack.c.bf16 %v438_v33, %v437_v32  ;;  %v470_v36 = vld [vmem:[#allocation9 + $0x1d8] sm:$0xff] }
  0xa5   :  { %357 = vmatmul.mubr.f32.vlgmr.msra.gmra.mrb[0].mxu1 %v1272_v46  ;;  %285 = vmatprep.mubr.f32.mxu0 %v1138_v0  ;;  %v894_v31 = vpack.c.bf16 %v452_v30, %v451_v29  ;;  %v421_v37 = vld [vmem:[#allocation9 + $0x50] sm:$0xff]  ;;  %v422_v38 = vld [vmem:[#allocation9 + $0x58] sm:$0xff]  ;;  %v896_v39 = vpack.c.bf16 %v470_v36, %v469_v34  ;;  %v439_v44 = vld [vmem:[#allocation9 + $0xe0] sm:$0xff] }
  0xa6   :  { %362 = vmatprep.mubr.f32.mxu1 %v1138_v0  ;;  %847 = vmatpush3.bf16.msra.mxu0 %v846_v49  ;;  %v886_v0 = vpack.c.bf16 %v448_v6, %v447_v5  ;;  %v866_v40 = vpack.c.bf16 %v422_v38, %v421_v37  ;;  %v453_v41 = vld [vmem:[#allocation9 + $0x150] sm:$0xff]  ;;  %v454_v42 = vld [vmem:[#allocation9 + $0x158] sm:$0xff]  ;;  %v440_v45 = vld [vmem:[#allocation9 + $0xe8] sm:$0xff] }
  0xa7   :  { %879 = vmatpush3.bf16.msra.mxu1 %v878_v50  ;;  %849 = vmatprep.subr.bf16.mxu0 %v848_v51  ;;  %v898_v43 = vpack.c.bf16 %v454_v42, %v453_v41  ;;  %v471_v47 = vld [vmem:[#allocation9 + $0x1e0] sm:$0xff]  ;;  %v868_v48 = vpack.c.bf16 %v440_v45, %v439_v44  ;;  %v472_v49 = vld [vmem:[#allocation9 + $0x1e8] sm:$0xff]  ;;  %v441_v57 = vld [vmem:[#allocation9 + $0xf0] sm:$0xff] }
  0xa8   :  { %286 = vmatmul.mubr.f32.gmra.mrb[2].mxu0 %v1277_v59  ;;  %881 = vmatprep.subr.bf16.mxu1 %v880_v55  ;;  %v423_v50 = vld [vmem:[#allocation9 + $0x60] sm:$0xff]  ;;  %v424_v51 = vld [vmem:[#allocation9 + $0x68] sm:$0xff]  ;;  %v900_v52 = vpack.c.bf16 %v472_v49, %v471_v47  ;;  %v442_v58 = vld [vmem:[#allocation9 + $0xf8] sm:$0xff] }
  0xa9   :  { %363 = vmatmul.mubr.f32.gmra.mrb[2].mxu1 %v1277_v59  ;;  %v870_v53 = vpack.c.bf16 %v424_v51, %v423_v50  ;;  %v455_v54 = vld [vmem:[#allocation9 + $0x160] sm:$0xff]  ;;  %v456_v55 = vld [vmem:[#allocation9 + $0x168] sm:$0xff]  ;;  %v473_v60 = vld [vmem:[#allocation9 + $0x1f0] sm:$0xff]  ;;  %v872_v61 = vpack.c.bf16 %v442_v58, %v441_v57 }
  0xaa   :  { %851 = vmatpush3.bf16.msra.mxu0 %v850_v62  ;;  %v902_v56 = vpack.c.bf16 %v456_v55, %v455_v54  ;;  %v474_v62 = vld [vmem:[#allocation9 + $0x1f8] sm:$0xff] }
  0xab   :  { %883 = vmatpush3.bf16.msra.mxu1 %v882_v63  ;;  %853 = vmatprep.subr.bf16.mxu0 %v852_v1  ;;  %v425_v63 = vld [vmem:[#allocation9 + $0x70] sm:$0xff]  ;;  %v426_v1 = vld [vmem:[#allocation9 + $0x78] sm:$0xff]  ;;  %v904_v2 = vpack.c.bf16 %v474_v62, %v473_v60 }
  0xac   :  { %885 = vmatprep.subr.bf16.mxu1 %v884_v4  ;;  %v874_v3 = vpack.c.bf16 %v426_v1, %v425_v63  ;;  %v457_v4 = vld [vmem:[#allocation9 + $0x170] sm:$0xff]  ;;  %v458_v5 = vld [vmem:[#allocation9 + $0x178] sm:$0xff] }
  0xad   :  { %v906_v6 = vpack.c.bf16 %v458_v5, %v457_v4  ;;  %v193_v9 = vld [vmem:[#allocation8] sm:$0xf] }
  0xae   :  { %855 = vmatpush3.bf16.msra.mxu0 %v854_v7  ;;  %v195_v7 = vlaneseq }
  0xaf   :  { %887 = vmatpush3.bf16.msra.mxu1 %v886_v0  ;;  %857 = vmatprep.subr.bf16.mxu0 %v856_v11 }
  0xb0   :  { %889 = vmatprep.subr.bf16.mxu1 %v888_v15  ;;  %v196_v0 = vshrl.u32 %v195_v7, 7 }
  0xb2   :  { %859 = vmatpush3.bf16.msra.mxu0 %v858_v16  ;;  %v197_v8 = vsub.s32 0, %v196_v0  ;;  %v205_v10 = vsub.s32 2, %v196_v0  ;;  %v201_v11 = vsub.s32 1, %v196_v0  ;;  %v209_v12 = vsub.s32 3, %v196_v0 }
  0xb3   :  { %891 = vmatpush3.bf16.msra.mxu1 %v890_v19  ;;  %861 = vmatprep.subr.bf16.mxu0 %v860_v23 }
  0xb4   :  { %893 = vmatprep.subr.bf16.mxu1 %v892_v27  ;;  %v198_v13 = vrot.slane %v193_v9, %v197_v8  ;;  %v206_v14 = vrot.slane %v193_v9, %v205_v10  ;;  %v202_v15 = vrot.slane %v193_v9, %v201_v11  ;;  %v210_v16 = vrot.slane %v193_v9, %v209_v12 }
  0xb6   :  { %863 = vmatpush3.bf16.msra.mxu0 %v862_v28 }
  0xb7   :  { %895 = vmatpush3.bf16.msra.mxu1 %v894_v31  ;;  %865 = vmatprep.subr.bf16.mxu0 %v864_v35 }
  0xb8   :  { %897 = vmatprep.subr.bf16.mxu1 %v896_v39 }
  0xba   :  { %867 = vmatpush3.bf16.msra.mxu0 %v866_v40 }
  0xbb   :  { %899 = vmatpush3.bf16.msra.mxu1 %v898_v43  ;;  %869 = vmatprep.subr.bf16.mxu0 %v868_v48 }
  0xbc   :  { %901 = vmatprep.subr.bf16.mxu1 %v900_v52 }
  0xbe   :  { %871 = vmatpush3.bf16.msra.mxu0 %v870_v53 }
  0xbf   :  { %903 = vmatpush3.bf16.msra.mxu1 %v902_v56  ;;  %873 = vmatprep.subr.bf16.mxu0 %v872_v61 }
  0xc0   :  { %905 = vmatprep.subr.bf16.mxu1 %v904_v2 }
  0xc2   :  { %875 = vmatpush3.bf16.msra.mxu0 %v874_v3 }
  0xc3   :  { %907 = vmatpush3.bf16.msra.mxu1 %v906_v6 }
 0x177   :  { %v281_v17 = vpop.f32.mrb[0].mxu0 }
 0x178   :  { %v282_v18 = vadd.f32 %v281_v17, %v198_v13  ;;  %v358_v19 = vpop.f32.mrb[0].mxu1  ;;  %v283_v20 = vpop.f32.mrb[1].mxu0  ;;  %v701_v17 = vld [vmem:[#allocation11] ss:$0 sm:$0xff] }
 0x179   :  { %v359_v21 = vadd.f32 %v358_v19, %v206_v14  ;;  %v284_v22 = vadd.f32 %v283_v20, %v202_v15  ;;  %v360_v23 = vpop.f32.mrb[1].mxu1 }
 0x17a   :  { %v377_v24 = vmul.f32 0.70710677, %v282_v18  ;;  %v361_v25 = vadd.f32 %v360_v23, %v210_v16  ;;  %v369_v50 = vmul.f32 0.5, %v282_v18 }
 0x17b   :  { %v379_v26 = vmul.f32 0.70710677, %v359_v21  ;;  %v378_v27 = vmul.f32 0.70710677, %v284_v22  ;;  %v287_v29 = vpop.f32.mrb[2].mxu0  ;;  %v370_v48 = vmul.f32 0.5, %v284_v22 }
 0x17c   :  { %921 = verf.f32 %v377_v24  ;;  %v380_v28 = vmul.f32 0.70710677, %v361_v25  ;;  %v364_v30 = vpop.f32.mrb[2].mxu1  ;;  %v288_v31 = vadd.f32 %v287_v29, %v198_v13  ;;  %v289_v33 = vpop.f32.mrb[3].mxu0  ;;  %v372_v51 = vmul.f32 0.5, %v361_v25 }
 0x17d   :  { %923 = verf.f32 %v379_v26  ;;  %v365_v32 = vadd.f32 %v364_v30, %v206_v14  ;;  %v366_v34 = vpop.f32.mrb[3].mxu1  ;;  %v290_v35 = vadd.f32 %v289_v33, %v202_v15  ;;  %v371_v54 = vmul.f32 0.5, %v359_v21 }
 0x17e   :  { %925 = verf.f32 %v378_v27  ;;  %v367_v36 = vadd.f32 %v366_v34, %v210_v16  ;;  %v381_v37 = vmul.f32 0.70710677, %v288_v31  ;;  %v373_v4 = vmul.f32 0.5, %v288_v31 }
 0x17f   :  { %927 = verf.f32 %v380_v28  ;;  %v383_v38 = vmul.f32 0.70710677, %v365_v32  ;;  %v382_v39 = vmul.f32 0.70710677, %v290_v35  ;;  %v374_v2 = vmul.f32 0.5, %v290_v35 }
 0x180   :  { %929 = verf.f32 %v381_v37  ;;  %v384_v40 = vmul.f32 0.70710677, %v367_v36  ;;  %v376_v5 = vmul.f32 0.5, %v367_v36  ;;  %v375_v7 = vmul.f32 0.5, %v365_v32 }
 0x181   :  { %931 = verf.f32 %v383_v38 }
 0x182   :  { %933 = verf.f32 %v382_v39 }
 0x183   :  { %935 = verf.f32 %v384_v40 }
 0x186   :  { %v922_v41 = vpop.eup %921 }
 0x187   :  { %v924_v42 = vpop.eup %923  ;;  %v393_v44 = vadd.f32 1.0, %v922_v41 }
 0x188   :  { %v926_v43 = vpop.eup %925  ;;  %v395_v47 = vadd.f32 1.0, %v924_v42 }
 0x189   :  { %v928_v45 = vpop.eup %927  ;;  %v394_v49 = vadd.f32 1.0, %v926_v43  ;;  %v401_v57 = vmul.f32 %v393_v44, %v369_v50  ;;  %v702_v43 = vld [vmem:[#allocation12] ss:$0 sm:$0xff] }
 0x18a   :  { %v396_v52 = vadd.f32 1.0, %v928_v45  ;;  %v930_v53 = vpop.eup %929  ;;  %v403_v61 = vmul.f32 %v395_v47, %v371_v54  ;;  %v703_v45 = vld [vmem:[#allocation14] ss:$0 sm:$0xff] }
 0x18b   :  { %v402_v55 = vmul.f32 %v394_v49, %v370_v48  ;;  %v932_v56 = vpop.eup %931  ;;  %v397_v62 = vadd.f32 1.0, %v930_v53 }
 0x18c   :  { %v404_v58 = vmul.f32 %v396_v52, %v372_v51  ;;  %v934_v60 = vpop.eup %933  ;;  %v399_v1 = vadd.f32 1.0, %v932_v56 }
 0x18d   :  { %539 = vmatprep.mubr.f32.mxu0 %v402_v55  ;;  %v936_v63 = vpop.eup %935  ;;  %v398_v3 = vadd.f32 1.0, %v934_v60  ;;  %v405_v9 = vmul.f32 %v397_v62, %v373_v4 }
 0x18e   :  { %614 = vmatprep.mubr.f32.mxu1 %v404_v58  ;;  %540 = vmatmul.mubr.f32.vlgmr.msra.gmra.mrb[4].mxu0 %v401_v57  ;;  %v400_v6 = vadd.f32 1.0, %v936_v63  ;;  %v407_v10 = vmul.f32 %v399_v1, %v375_v7 }
 0x18f   :  { %615 = vmatmul.mubr.f32.vlgmr.msra.gmra.mrb[4].mxu1 %v403_v61  ;;  %v406_v0 = vmul.f32 %v398_v3, %v374_v2 }
 0x190   :  { %v408_v8 = vmul.f32 %v400_v6, %v376_v5 }
 0x191   :  { %544 = vmatprep.mubr.f32.mxu0 %v406_v0 }
 0x192   :  { %619 = vmatprep.mubr.f32.mxu1 %v408_v8  ;;  %545 = vmatmul.mubr.f32.gmra.mrb[6].mxu0 %v405_v9 }
 0x193   :  { %620 = vmatmul.mubr.f32.gmra.mrb[6].mxu1 %v407_v10 }
 0x261   :  { %v736_v11 = vpop.f32.mrb[4].mxu0 }
 0x262   :  { %v774_v12 = vpop.f32.mrb[4].mxu1  ;;  %v737_v13 = vpop.f32.mrb[5].mxu0 }
 0x263   :  { %v738_v14 = vadd.f32 %v737_v13, %v736_v11  ;;  %v775_v15 = vpop.f32.mrb[5].mxu1 }
 0x264   :  { %v776_v16 = vadd.f32 %v775_v15, %v774_v12 }
 0x265   :  { %v739_v19 = vpop.f32.mrb[6].mxu0 }
 0x266   :  { %v617_v18 = vadd.f32 %v776_v16, %v738_v14  ;;  %v777_v20 = vpop.f32.mrb[6].mxu1  ;;  %v740_v21 = vpop.f32.mrb[7].mxu0 }
 0x267   :  { %v741_v22 = vadd.f32 %v740_v21, %v739_v19  ;;  %v778_v23 = vpop.f32.mrb[7].mxu1 }
 0x268   :  { %v625_v24 = vadd.f32 %v701_v17, %v617_v18  ;;  %v779_v25 = vadd.f32 %v778_v23, %v777_v20 }
 0x26a   :  { %v636_v26 = vadd.f32 %v625_v24, %v1272_v46  ;;  %v622_v27 = vadd.f32 %v779_v25, %v741_v22 }
 0x26c   :  { %638 = vadd.xlane.f32.xlu0 %v636_v26  ;;  %v626_v28 = vadd.f32 %v701_v17, %v622_v27 }
 0x26e   :  { %v637_v29 = vadd.f32 %v626_v28, %v1277_v59 }
 0x270   :  { %640 = vadd.xlane.f32.xlu0 %v637_v29 }
 0x2f9   :  { %v639_v30 = vpop.xlane.xlu0 %638 }
 0x2fa   :  { %v643_v31 = vmul.f32 0.0078125, %v639_v30 }
 0x2fc   :  { %v645_v32 = vsub.f32 %v636_v26, %v643_v31 }
 0x2fd   :  { %v641_v33 = vpop.xlane.xlu0 %640 }
 0x2fe   :  { %v647_v34 = vmul.f32 %v645_v32, %v645_v32  ;;  %v644_v35 = vmul.f32 0.0078125, %v641_v33 }
 0x300   :  { %649 = vadd.xlane.f32.xlu1 %v647_v34  ;;  %v646_v36 = vsub.f32 %v637_v29, %v644_v35 }
 0x302   :  { %v648_v37 = vmul.f32 %v646_v36, %v646_v36 }
 0x304   :  { %651 = vadd.xlane.f32.xlu1 %v648_v37 }
 0x38d   :  { %v650_v38 = vpop.xlane.xlu1 %649 }
 0x38e   :  { %v653_v39 = vmul.f32 0.0078125, %v650_v38 }
 0x390   :  { %v655_v40 = vadd.f32 1e-06, %v653_v39 }
 0x391   :  { %v652_v46 = vpop.xlane.xlu1 %651 }
 0x392   :  { %937 = vrsqrt.f32 %v655_v40  ;;  %v654_v41 = vmul.f32 0.0078125, %v652_v46 }
 0x394   :  { %v656_v42 = vadd.f32 1e-06, %v654_v41 }
 0x396   :  { %939 = vrsqrt.f32 %v656_v42 }
 0x39c   :  { %v938_v59 = vpop.eup %937 }
 0x39d   :  { %v659_v44 = vmul.f32 %v938_v59, %v645_v32 }
 0x39f   :  { %v668_v47 = vmul.f32 %v702_v43, %v659_v44 }
 0x3a0   :  { %v940_v48 = vpop.eup %939 }
 0x3a1   :  { %v677_v49 = vadd.f32 %v703_v45, %v668_v47  ;;  %v660_v50 = vmul.f32 %v940_v48, %v646_v36 }
 0x3a3   :  { %679 = vst [vmem:[#allocation15] sm:$0xff] %v677_v49  ;;  %v669_v51 = vmul.f32 %v702_v43, %v660_v50 }
 0x3a5   :  { %v678_v52 = vadd.f32 %v703_v45, %v669_v51 }
 0x3a7   :  { %680 = vst [vmem:[#allocation15 + $0x8] sm:$0xff] %v678_v52 }
 0x3a8   :  { %1106 = shalt.err (!%p1103_p4)
}
 0x3a9   :  { %s1107_s20 = scalar_lea.hbm %s1306_s7, 256 }
 0x3aa   :  { %p1108_p5 = scmp.ne.s32.totalorder %s1306_s7, %s1107_s20  ;;  %p1111_p6 = scmp.lt.u32.totalorder %s1107_s20, %s1306_s7 }
 0x3ac   :  { %p1113_p7 = pnand %p1111_p6, %p1108_p5 }
 0x3ae   :  { %1116 = shalt.err (!%p1113_p7)
}
 0x3af   :  { %692 = dma.vmem_to_hbm [thread:$0]  %s687_s3, 256, %s1306_s7, [#allocation5], %s1132_s25, %s1132_s25, %s1133_s27  }
 0x3b0   :  { %1125 = dma.done.wait [#allocation5], 256  }
 0x3b1   :  { %1126 = vsyncadd [#allocation5], 4294967040 }
 0x3b2   :  { %696 = vsyncpa [#allocation4], 1 }
 0x3b3   :  { %697 = vsyncpa [#allocation7], 1 }
 0x3b4   :  { %698 = vsyncpa [#allocation10], 1 }
 0x3b5   :  { %699 = vsyncpa [#allocation13], 1 }
 0x3b6   :  { %700 = vsyncpa [#allocation5], 1 }

</bundles_post_ra>
